<compile_context>
chip_gen: v7x
topology: tpu7x:2x2x1
jax: 0.10.0
libtpu: 0.0.40
codegen_flags: <defaults>
</compile_context>

<pallas_src>
import jax
import jax.numpy as jnp
from jax import lax
from jax.experimental import pallas as pl
from jax.experimental.pallas import tpu as pltpu

# stand-in for RNNConfig
EMBEDDING_DIM = 32
HIDDEN_DIM = 32
NUM_CLASSES = 2

_GW = 128     # padded per-gate block width: [fwd H | bwd H | zero pad] lanes
_CW = 128     # padded carry (h / c) width:  [h_f   | h_b   | zero pad] lanes
_CP = 128     # padded class width (lane-dense output store)
_NEG = -1e30  # pad-class logit bias -> exp underflows to 0 in log_softmax


# ----------------------------------------------------------------------------
# Pallas kernel factory: fused bidirectional LSTM recurrence + fc + log_softmax
# ----------------------------------------------------------------------------
def _make_lstm_kernel(seq_len, t_chunk, unroll):
    guard_tail = (seq_len % t_chunk) != 0   # only emitted when T_pad != T

    def kernel(xs_ref,    # (Tc, tb, 2E) bf16 : [x_t || x_{T-1-t}] per step
               wx_ref,    # (2E, 4*GW)   bf16 : fused input weights (both dirs)
               wh_ref,    # (CW, 4*GW)   bf16 : fused recurrent weights
               b_ref,     # (1, 4*GW)    f32  : fused biases (b_ih + b_hh)
               fcw_ref,   # (CW, CP)     bf16 : padded fc weights
               fcb_ref,   # (1, CP)      f32  : padded fc bias (-1e30 pad lanes)
               out_ref,   # (tb, CP)     f32  : log-probs (lane-dense store)
               h_scr,     # (tb, CW)     f32  : hidden carry across T chunks
               c_scr):    # (tb, CW)     f32  : cell   carry across T chunks
        tc = pl.program_id(1)

        @pl.when(tc == 0)
        def _init():
            h_scr[...] = jnp.zeros_like(h_scr)
            c_scr[...] = jnp.zeros_like(c_scr)

        tb = out_ref.shape[0]
        wx = wx_ref[...]                                   # resident across loop
        wh = wh_ref[...]
        # hoist the sublane broadcast out of the loop (JAX does not CSE it)
        bias = jnp.broadcast_to(b_ref[...], (tb, 4 * _GW))

        def step(tt, carry):
            h, c = carry                                   # (tb, CW) f32
            xt = xs_ref[tt]                                # (tb, 2E) bf16
            # one K=64 and one K=128 MXU matmul per step, f32 accumulate,
            # gate column blocks: [i | f | o | g], each 128 lanes
            gates = (jnp.dot(xt, wx, preferred_element_type=jnp.float32)
                     + jnp.dot(h.astype(jnp.bfloat16), wh,
                               preferred_element_type=jnp.float32)
                     + bias)                               # (tb, 512) f32
            sig = jax.nn.sigmoid(gates[:, :3 * _GW])       # contiguous i, f, o
            g = jnp.tanh(gates[:, 3 * _GW:])               # contiguous g
            i = sig[:, 0 * _GW:1 * _GW]                    # full vregs, no rotates
            f = sig[:, 1 * _GW:2 * _GW]
            o = sig[:, 2 * _GW:3 * _GW]
            c_new = f * c + i * g
            h_new = o * jnp.tanh(c_new)
            if guard_tail:                                 # mask padded tail steps
                keep = (tc * t_chunk + tt) < seq_len
                h_new = jnp.where(keep, h_new, h)
                c_new = jnp.where(keep, c_new, c)
            return h_new, c_new

        h, c = lax.fori_loop(0, t_chunk, step, (h_scr[...], c_scr[...]),
                             unroll=unroll)
        h_scr[...] = h
        c_scr[...] = c

        @pl.when(tc == pl.num_programs(1) - 1)
        def _finalize():
            # h lanes [0:2H] == concat(final fwd hidden, final bwd hidden)
            logits = (jnp.dot(h.astype(jnp.bfloat16), fcw_ref[...],
                              preferred_element_type=jnp.float32)
                      + fcb_ref[...])                      # (tb, 128) f32
            out_ref[...] = jax.nn.log_softmax(logits, axis=1)

    return kernel


# ----------------------------------------------------------------------------
# Weight fusion helpers (one-time layout plumbing, plain XLA)
# ----------------------------------------------------------------------------
def _fuse_params(params, E, H, C):
    """Build padded, vreg-aligned fused weights from PyTorch-style params."""
    def kernel_gate_order(w):   # torch column order [i, f, g, o] -> kernel [i, f, o, g]
        return (w[:, 0:H], w[:, H:2 * H], w[:, 3 * H:4 * H], w[:, 2 * H:3 * H])

    wx = jnp.zeros((2 * E, 4 * _GW), jnp.float32)
    wh = jnp.zeros((_CW, 4 * _GW), jnp.float32)
    b = jnp.zeros((1, 4 * _GW), jnp.float32)

    gx_f, gx_b = kernel_gate_order(params["wih_f"]), kernel_gate_order(params["wih_b"])
    gh_f, gh_b = kernel_gate_order(params["whh_f"]), kernel_gate_order(params["whh_b"])
    gb_f, gb_b = kernel_gate_order(params["b_f"]), kernel_gate_order(params["b_b"])

    for k in range(4):                      # gate blocks [i, f, o, g]
        c0 = k * _GW
        wx = wx.at[0:E, c0:c0 + H].set(gx_f[k])                 # x_t   -> fwd lanes
        wx = wx.at[E:2 * E, c0 + H:c0 + 2 * H].set(gx_b[k])     # x_rev -> bwd lanes
        wh = wh.at[0:H, c0:c0 + H].set(gh_f[k])                 # h_f   -> fwd lanes
        wh = wh.at[H:2 * H, c0 + H:c0 + 2 * H].set(gh_b[k])     # h_b   -> bwd lanes
        b = b.at[:, c0:c0 + H].set(gb_f[k])
        b = b.at[:, c0 + H:c0 + 2 * H].set(gb_b[k])

    fcw = jnp.zeros((_CW, _CP), jnp.float32).at[0:2 * H, 0:C].set(params["fc_w"])
    fcb = jnp.full((1, _CP), _NEG, jnp.float32).at[:, 0:C].set(params["fc_b"])
    return (wx.astype(jnp.bfloat16), wh.astype(jnp.bfloat16), b,
            fcw.astype(jnp.bfloat16), fcb)


# ----------------------------------------------------------------------------
# Forward wrapper
# ----------------------------------------------------------------------------
def lstm_forward(tokens, params):
    """tokens: (B, T) int32. Returns (B, NUM_CLASSES) log-probs."""
    E, H, C = EMBEDDING_DIM, HIDDEN_DIM, NUM_CLASSES
    B, T = tokens.shape

    wx, wh, bias, fcw, fcb = _fuse_params(params, H=H, E=E, C=C)

    # Embedding gather stays in XLA; build the compact bf16 per-step input
    # [x_t || x_{T-1-t}] so the kernel folds the input projection into the
    # per-step matmul (no (T, B, 8H) f32 xproj materialized in HBM).
    x = jnp.take(params["embedding"], tokens, axis=0)              # (B, T, E)
    x = jnp.transpose(x, (1, 0, 2))                                # (T, B, E) time-major
    xstack = jnp.concatenate([x, x[::-1]], axis=-1).astype(jnp.bfloat16)  # (T, B, 2E)

    # Batch tiling: multiple of 8, >=2 blocks when large (v7x has 2 TensorCores).
    B_pad = max(8, ((B + 7) // 8) * 8)
    if B_pad <= 8:
        tb = 8
    else:
        tb = min(128, max(8, ((B_pad // 2) // 8) * 8))
    B_pad = ((B_pad + tb - 1) // tb) * tb

    # Time chunking (bounds VMEM on v7x, pipelines xstack DMA under compute).
    MAX_T_CHUNK = 256
    t_chunk = T if T <= MAX_T_CHUNK else MAX_T_CHUNK
    T_pad = ((T + t_chunk - 1) // t_chunk) * t_chunk
    unroll = True if t_chunk <= 16 else 8

    xstack = jnp.pad(xstack, ((0, T_pad - T), (0, B_pad - B), (0, 0)))

    grid = (B_pad // tb, T_pad // t_chunk)

    # Explicit scoped-VMEM budget (v5e default is only 16 MiB; cap at v7x's 64 MiB).
    xs_blk = t_chunk * tb * (2 * E) * 2
    w_blk = (wx.size + wh.size + fcw.size) * 2 + (bias.size + fcb.size) * 4
    out_blk = tb * _CP * 4
    scratch_b = 2 * tb * _CW * 4
    need = 2 * (xs_blk + w_blk + out_blk) + scratch_b
    vmem_limit = int(min(64 * 2**20, max(4 * need, 16 * 2**20)))

    kernel = _make_lstm_kernel(seq_len=T, t_chunk=t_chunk, unroll=unroll)

    out = pl.pallas_call(
        kernel,
        out_shape=jax.ShapeDtypeStruct((B_pad, _CP), jnp.float32),
        grid_spec=pltpu.PrefetchScalarGridSpec(
            num_scalar_prefetch=0,
            grid=grid,
            in_specs=[
                pl.BlockSpec((t_chunk, tb, 2 * E), lambda b, t: (t, b, 0)),  # xstack (T-chunked, batch-sharded)
                pl.BlockSpec((2 * E, 4 * _GW), lambda b, t: (0, 0)),         # Wx (replicated)
                pl.BlockSpec((_CW, 4 * _GW), lambda b, t: (0, 0)),           # Wh (replicated)
                pl.BlockSpec((1, 4 * _GW), lambda b, t: (0, 0)),             # fused bias
                pl.BlockSpec((_CW, _CP), lambda b, t: (0, 0)),               # fc weights (padded)
                pl.BlockSpec((1, _CP), lambda b, t: (0, 0)),                 # fc bias (padded)
            ],
            out_specs=pl.BlockSpec((tb, _CP), lambda b, t: (b, 0)),          # lane-dense output block
            scratch_shapes=[
                pltpu.VMEM((tb, _CW), jnp.float32),   # h carry across T chunks
                pltpu.VMEM((tb, _CW), jnp.float32),   # c carry across T chunks
            ],
        ),
        compiler_params=pltpu.CompilerParams(
            dimension_semantics=("parallel", "arbitrary"),
            vmem_limit_bytes=vmem_limit,
        ),
    )(xstack, wx, wh, bias, fcw, fcb)

    return out[:B, :C]


# ----------------------------------------------------------------------------
# Init + pure-JAX reference (standard PyTorch layout, f32 throughout)
# ----------------------------------------------------------------------------
def init_params(key, vocab_size, E=EMBEDDING_DIM, H=HIDDEN_DIM, C=NUM_CLASSES):
    ks = jax.random.split(key, 9)
    s = 0.1
    return {
        "embedding": s * jax.random.normal(ks[0], (vocab_size, E), jnp.float32),
        # gate order [i, f, g, o], right-multiply layout (PyTorch nn.LSTM convention)
        "wih_f": s * jax.random.normal(ks[1], (E, 4 * H), jnp.float32),
        "whh_f": s * jax.random.normal(ks[2], (H, 4 * H), jnp.float32),
        "b_f":   s * jax.random.normal(ks[3], (1, 4 * H), jnp.float32),  # b_ih + b_hh folded
        "wih_b": s * jax.random.normal(ks[4], (E, 4 * H), jnp.float32),
        "whh_b": s * jax.random.normal(ks[5], (H, 4 * H), jnp.float32),
        "b_b":   s * jax.random.normal(ks[6], (1, 4 * H), jnp.float32),
        "fc_w":  s * jax.random.normal(ks[7], (2 * H, C), jnp.float32),
        "fc_b":  s * jax.random.normal(ks[8], (1, C), jnp.float32),
    }


def _reference_forward(tokens, params):
    """Pure-JAX f32 reference with identical semantics (correctness check)."""
    H = HIDDEN_DIM
    x = jnp.take(params["embedding"], tokens, axis=0).astype(jnp.float32)  # (B, T, E)
    B, T, _ = x.shape

    def cell(x_t, h, c, wih, whh, b):
        g = x_t @ wih + h @ whh + b
        i = jax.nn.sigmoid(g[:, :H])
        f = jax.nn.sigmoid(g[:, H:2 * H])
        gg = jnp.tanh(g[:, 2 * H:3 * H])
        o = jax.nn.sigmoid(g[:, 3 * H:])
        c = f * c + i * gg
        return o * jnp.tanh(c), c

    h_f = c_f = h_b = c_b = jnp.zeros((B, H), jnp.float32)
    for t in range(T):
        h_f, c_f = cell(x[:, t], h_f, c_f, params["wih_f"], params["whh_f"], params["b_f"])
        h_b, c_b = cell(x[:, T - 1 - t], h_b, c_b, params["wih_b"], params["whh_b"], params["b_b"])
    feat = jnp.concatenate([h_f, h_b], axis=1)
    logits = feat @ params["fc_w"] + params["fc_b"]
    return jax.nn.log_softmax(logits, axis=1)


if __name__ == "__main__":
    key = jax.random.PRNGKey(0)
    vocab_size = 50
    B, T = 2, 8

    pkey, tkey = jax.random.split(key)
    params = init_params(pkey, vocab_size)
    tokens = jax.random.randint(tkey, (B, T), 0, vocab_size, dtype=jnp.int32)

    out = lstm_forward(tokens, params)
    out = jax.block_until_ready(out)

    ref = jax.block_until_ready(_reference_forward(tokens, params))
    assert out.shape == (B, NUM_CLASSES)
    # Matmul operands are bf16 in the kernel path (f32 accumulate), so allow
    # ~1e-2-level differences vs the all-f32 reference.
    assert jnp.allclose(out, ref, atol=2e-2, rtol=2e-2), "mismatch vs reference"
    print("KERNEL_OK")
</pallas_src>

<mosaic_0001>
module attributes {stable_mosaic.version = 11 : i64} {
  func.func @kernel(%arg0: i32, %arg1: i32, %arg2: memref<8x8x64xbf16, #tpu.memory_space<vmem>>, %arg3: memref<64x512xbf16, #tpu.memory_space<vmem>>, %arg4: memref<128x512xbf16, #tpu.memory_space<vmem>>, %arg5: memref<1x512xf32, #tpu.memory_space<vmem>>, %arg6: memref<128x128xbf16, #tpu.memory_space<vmem>>, %arg7: memref<1x128xf32, #tpu.memory_space<vmem>>, %arg8: memref<8x128xf32, #tpu.memory_space<vmem>>, %arg9: memref<8x128xf32, #tpu.memory_space<vmem>>, %arg10: memref<8x128xf32, #tpu.memory_space<vmem>>) attributes {dimension_semantics = [#tpu.dimension_semantics<parallel>, #tpu.dimension_semantics<arbitrary>], iteration_bounds = array<i64: 1, 1>, scalar_prefetch = 0 : i64, scratch_operands = 2 : i64, tpu.core_type = #tpu.core_type<tc>, window_params = [{transform_indices = @transform_0, window_bounds = array<i64: 8, 8, 64>}, {pipeline_mode = #tpu.pipeline_mode<synchronous>, transform_indices = @transform_1, window_bounds = array<i64: 64, 512>}, {pipeline_mode = #tpu.pipeline_mode<synchronous>, transform_indices = @transform_2, window_bounds = array<i64: 128, 512>}, {pipeline_mode = #tpu.pipeline_mode<synchronous>, transform_indices = @transform_3, window_bounds = array<i64: 1, 512>}, {pipeline_mode = #tpu.pipeline_mode<synchronous>, transform_indices = @transform_4, window_bounds = array<i64: 128, 128>}, {pipeline_mode = #tpu.pipeline_mode<synchronous>, transform_indices = @transform_5, window_bounds = array<i64: 1, 128>}, {transform_indices = @transform_6, window_bounds = array<i64: 8, 128>}]} {
    %c0_i32 = arith.constant 0 : i32
    %0 = arith.cmpi eq, %arg1, %c0_i32 : i32
    %1 = arith.extui %0 : i1 to i32
    %c0_i32_0 = arith.constant 0 : i32
    %2 = arith.cmpi ne, %1, %c0_i32_0 : i32
    scf.if %2 {
      %cst_56 = arith.constant 0.000000e+00 : f32
      %207 = vector.broadcast %cst_56 : f32 to vector<8x128xf32>
      %c0_57 = arith.constant 0 : index
      %c0_58 = arith.constant 0 : index
      %208 = vector.load %arg9[%c0_57, %c0_58] : memref<8x128xf32, #tpu.memory_space<vmem>>, vector<8x128xf32>
      tpu.vector_store %arg9[%c0_57, %c0_58], %207 {strides = array<i32>} : memref<8x128xf32, #tpu.memory_space<vmem>>, vector<8x128xf32>,
      %cst_59 = arith.constant 0.000000e+00 : f32
      %209 = vector.broadcast %cst_59 : f32 to vector<8x128xf32>
      %c0_60 = arith.constant 0 : index
      %c0_61 = arith.constant 0 : index
      %210 = vector.load %arg10[%c0_60, %c0_61] : memref<8x128xf32, #tpu.memory_space<vmem>>, vector<8x128xf32>
      tpu.vector_store %arg10[%c0_60, %c0_61], %209 {strides = array<i32>} : memref<8x128xf32, #tpu.memory_space<vmem>>, vector<8x128xf32>,
    } else {
    }
    %c0 = arith.constant 0 : index
    %c0_1 = arith.constant 0 : index
    %3 = vector.load %arg3[%c0, %c0_1] : memref<64x512xbf16, #tpu.memory_space<vmem>>, vector<64x512xbf16>
    %c0_2 = arith.constant 0 : index
    %c0_3 = arith.constant 0 : index
    %4 = vector.load %arg4[%c0_2, %c0_3] : memref<128x512xbf16, #tpu.memory_space<vmem>>, vector<128x512xbf16>
    %c0_4 = arith.constant 0 : index
    %c0_5 = arith.constant 0 : index
    %5 = vector.load %arg5[%c0_4, %c0_5] : memref<1x512xf32, #tpu.memory_space<vmem>>, vector<1x512xf32>
    %6 = vector.shape_cast %5 : vector<1x512xf32> to vector<1x512xf32>
    %7 = vector.broadcast %6 : vector<1x512xf32> to vector<8x512xf32>
    %c0_6 = arith.constant 0 : index
    %c0_7 = arith.constant 0 : index
    %8 = vector.load %arg9[%c0_6, %c0_7] : memref<8x128xf32, #tpu.memory_space<vmem>>, vector<8x128xf32>
    %c0_8 = arith.constant 0 : index
    %c0_9 = arith.constant 0 : index
    %9 = vector.load %arg10[%c0_8, %c0_9] : memref<8x128xf32, #tpu.memory_space<vmem>>, vector<8x128xf32>
    %c0_i32_10 = arith.constant 0 : i32
    %10 = arith.index_cast %c0_i32_10 : i32 to index
    %c0_11 = arith.constant 0 : index
    %c0_12 = arith.constant 0 : index
    %11 = vector.load %arg2[%10, %c0_11, %c0_12] : memref<8x8x64xbf16, #tpu.memory_space<vmem>>, vector<1x8x64xbf16>
    %12 = vector.shape_cast %11 : vector<1x8x64xbf16> to vector<8x64xbf16>
    %cst = arith.constant dense<0.000000e+00> : vector<8x512xf32>
    %13 = tpu.matmul %12, %3, %cst {dimension_numbers = #tpu.dot_dimension_numbers<[1], [0], [0], [1], [0, 0, 1, 1], [], []>} : vector<8x64xbf16>, vector<64x512xbf16>, vector<8x512xf32> -> vector<8x512xf32>
    %14 = arith.truncf %8 : vector<8x128xf32> to vector<8x128xbf16>
    %cst_13 = arith.constant dense<0.000000e+00> : vector<8x512xf32>
    %15 = tpu.matmul %14, %4, %cst_13 {dimension_numbers = #tpu.dot_dimension_numbers<[1], [0], [0], [1], [0, 0, 1, 1], [], []>} : vector<8x128xbf16>, vector<128x512xbf16>, vector<8x512xf32> -> vector<8x512xf32>
    %16 = arith.addf %13, %15 : vector<8x512xf32>
    %17 = arith.addf %16, %7 : vector<8x512xf32>
    %18 = vector.extract_strided_slice %17 {offsets = [0, 0], sizes = [8, 384], strides = [1, 1]} : vector<8x512xf32> to vector<8x384xf32>
    %19 = arith.negf %18 : vector<8x384xf32>
    %20 = math.exp %19 : vector<8x384xf32>
    %cst_14 = arith.constant 1.000000e+00 : f32
    %21 = vector.broadcast %cst_14 : f32 to vector<8x384xf32>
    %22 = arith.addf %21, %20 : vector<8x384xf32>
    %23 = arith.divf %21, %22 : vector<8x384xf32>
    %24 = vector.extract_strided_slice %17 {offsets = [0, 384], sizes = [8, 128], strides = [1, 1]} : vector<8x512xf32> to vector<8x128xf32>
    %25 = math.tanh %24 : vector<8x128xf32>
    %26 = vector.extract_strided_slice %23 {offsets = [0, 0], sizes = [8, 128], strides = [1, 1]} : vector<8x384xf32> to vector<8x128xf32>
    %27 = vector.extract_strided_slice %23 {offsets = [0, 128], sizes = [8, 128], strides = [1, 1]} : vector<8x384xf32> to vector<8x128xf32>
    %28 = vector.extract_strided_slice %23 {offsets = [0, 256], sizes = [8, 128], strides = [1, 1]} : vector<8x384xf32> to vector<8x128xf32>
    %29 = arith.mulf %27, %9 : vector<8x128xf32>
    %30 = arith.mulf %26, %25 : vector<8x128xf32>
    %31 = arith.addf %29, %30 : vector<8x128xf32>
    %32 = math.tanh %31 : vector<8x128xf32>
    %33 = arith.mulf %28, %32 : vector<8x128xf32>
    %c1_i32 = arith.constant 1 : i32
    %34 = arith.index_cast %c1_i32 : i32 to index
    %c0_15 = arith.constant 0 : index
    %c0_16 = arith.constant 0 : index
    %35 = vector.load %arg2[%34, %c0_15, %c0_16] : memref<8x8x64xbf16, #tpu.memory_space<vmem>>, vector<1x8x64xbf16>
    %36 = vector.shape_cast %35 : vector<1x8x64xbf16> to vector<8x64xbf16>
    %cst_17 = arith.constant dense<0.000000e+00> : vector<8x512xf32>
    %37 = tpu.matmul %36, %3, %cst_17 {dimension_numbers = #tpu.dot_dimension_numbers<[1], [0], [0], [1], [0, 0, 1, 1], [], []>} : vector<8x64xbf16>, vector<64x512xbf16>, vector<8x512xf32> -> vector<8x512xf32>
    %38 = arith.truncf %33 : vector<8x128xf32> to vector<8x128xbf16>
    %cst_18 = arith.constant dense<0.000000e+00> : vector<8x512xf32>
    %39 = tpu.matmul %38, %4, %cst_18 {dimension_numbers = #tpu.dot_dimension_numbers<[1], [0], [0], [1], [0, 0, 1, 1], [], []>} : vector<8x128xbf16>, vector<128x512xbf16>, vector<8x512xf32> -> vector<8x512xf32>
    %40 = arith.addf %37, %39 : vector<8x512xf32>
    %41 = arith.addf %40, %7 : vector<8x512xf32>
    %42 = vector.extract_strided_slice %41 {offsets = [0, 0], sizes = [8, 384], strides = [1, 1]} : vector<8x512xf32> to vector<8x384xf32>
    %43 = arith.negf %42 : vector<8x384xf32>
    %44 = math.exp %43 : vector<8x384xf32>
    %cst_19 = arith.constant 1.000000e+00 : f32
    %45 = vector.broadcast %cst_19 : f32 to vector<8x384xf32>
    %46 = arith.addf %45, %44 : vector<8x384xf32>
    %47 = arith.divf %45, %46 : vector<8x384xf32>
    %48 = vector.extract_strided_slice %41 {offsets = [0, 384], sizes = [8, 128], strides = [1, 1]} : vector<8x512xf32> to vector<8x128xf32>
    %49 = math.tanh %48 : vector<8x128xf32>
    %50 = vector.extract_strided_slice %47 {offsets = [0, 0], sizes = [8, 128], strides = [1, 1]} : vector<8x384xf32> to vector<8x128xf32>
    %51 = vector.extract_strided_slice %47 {offsets = [0, 128], sizes = [8, 128], strides = [1, 1]} : vector<8x384xf32> to vector<8x128xf32>
    %52 = vector.extract_strided_slice %47 {offsets = [0, 256], sizes = [8, 128], strides = [1, 1]} : vector<8x384xf32> to vector<8x128xf32>
    %53 = arith.mulf %51, %31 : vector<8x128xf32>
    %54 = arith.mulf %50, %49 : vector<8x128xf32>
    %55 = arith.addf %53, %54 : vector<8x128xf32>
    %56 = math.tanh %55 : vector<8x128xf32>
    %57 = arith.mulf %52, %56 : vector<8x128xf32>
    %c2_i32 = arith.constant 2 : i32
    %58 = arith.index_cast %c2_i32 : i32 to index
    %c0_20 = arith.constant 0 : index
    %c0_21 = arith.constant 0 : index
    %59 = vector.load %arg2[%58, %c0_20, %c0_21] : memref<8x8x64xbf16, #tpu.memory_space<vmem>>, vector<1x8x64xbf16>
    %60 = vector.shape_cast %59 : vector<1x8x64xbf16> to vector<8x64xbf16>
    %cst_22 = arith.constant dense<0.000000e+00> : vector<8x512xf32>
    %61 = tpu.matmul %60, %3, %cst_22 {dimension_numbers = #tpu.dot_dimension_numbers<[1], [0], [0], [1], [0, 0, 1, 1], [], []>} : vector<8x64xbf16>, vector<64x512xbf16>, vector<8x512xf32> -> vector<8x512xf32>
    %62 = arith.truncf %57 : vector<8x128xf32> to vector<8x128xbf16>
    %cst_23 = arith.constant dense<0.000000e+00> : vector<8x512xf32>
    %63 = tpu.matmul %62, %4, %cst_23 {dimension_numbers = #tpu.dot_dimension_numbers<[1], [0], [0], [1], [0, 0, 1, 1], [], []>} : vector<8x128xbf16>, vector<128x512xbf16>, vector<8x512xf32> -> vector<8x512xf32>
    %64 = arith.addf %61, %63 : vector<8x512xf32>
    %65 = arith.addf %64, %7 : vector<8x512xf32>
    %66 = vector.extract_strided_slice %65 {offsets = [0, 0], sizes = [8, 384], strides = [1, 1]} : vector<8x512xf32> to vector<8x384xf32>
    %67 = arith.negf %66 : vector<8x384xf32>
    %68 = math.exp %67 : vector<8x384xf32>
    %cst_24 = arith.constant 1.000000e+00 : f32
    %69 = vector.broadcast %cst_24 : f32 to vector<8x384xf32>
    %70 = arith.addf %69, %68 : vector<8x384xf32>
    %71 = arith.divf %69, %70 : vector<8x384xf32>
    %72 = vector.extract_strided_slice %65 {offsets = [0, 384], sizes = [8, 128], strides = [1, 1]} : vector<8x512xf32> to vector<8x128xf32>
    %73 = math.tanh %72 : vector<8x128xf32>
    %74 = vector.extract_strided_slice %71 {offsets = [0, 0], sizes = [8, 128], strides = [1, 1]} : vector<8x384xf32> to vector<8x128xf32>
    %75 = vector.extract_strided_slice %71 {offsets = [0, 128], sizes = [8, 128], strides = [1, 1]} : vector<8x384xf32> to vector<8x128xf32>
    %76 = vector.extract_strided_slice %71 {offsets = [0, 256], sizes = [8, 128], strides = [1, 1]} : vector<8x384xf32> to vector<8x128xf32>
    %77 = arith.mulf %75, %55 : vector<8x128xf32>
    %78 = arith.mulf %74, %73 : vector<8x128xf32>
    %79 = arith.addf %77, %78 : vector<8x128xf32>
    %80 = math.tanh %79 : vector<8x128xf32>
    %81 = arith.mulf %76, %80 : vector<8x128xf32>
    %c3_i32 = arith.constant 3 : i32
    %82 = arith.index_cast %c3_i32 : i32 to index
    %c0_25 = arith.constant 0 : index
    %c0_26 = arith.constant 0 : index
    %83 = vector.load %arg2[%82, %c0_25, %c0_26] : memref<8x8x64xbf16, #tpu.memory_space<vmem>>, vector<1x8x64xbf16>
    %84 = vector.shape_cast %83 : vector<1x8x64xbf16> to vector<8x64xbf16>
    %cst_27 = arith.constant dense<0.000000e+00> : vector<8x512xf32>
    %85 = tpu.matmul %84, %3, %cst_27 {dimension_numbers = #tpu.dot_dimension_numbers<[1], [0], [0], [1], [0, 0, 1, 1], [], []>} : vector<8x64xbf16>, vector<64x512xbf16>, vector<8x512xf32> -> vector<8x512xf32>
    %86 = arith.truncf %81 : vector<8x128xf32> to vector<8x128xbf16>
    %cst_28 = arith.constant dense<0.000000e+00> : vector<8x512xf32>
    %87 = tpu.matmul %86, %4, %cst_28 {dimension_numbers = #tpu.dot_dimension_numbers<[1], [0], [0], [1], [0, 0, 1, 1], [], []>} : vector<8x128xbf16>, vector<128x512xbf16>, vector<8x512xf32> -> vector<8x512xf32>
    %88 = arith.addf %85, %87 : vector<8x512xf32>
    %89 = arith.addf %88, %7 : vector<8x512xf32>
    %90 = vector.extract_strided_slice %89 {offsets = [0, 0], sizes = [8, 384], strides = [1, 1]} : vector<8x512xf32> to vector<8x384xf32>
    %91 = arith.negf %90 : vector<8x384xf32>
    %92 = math.exp %91 : vector<8x384xf32>
    %cst_29 = arith.constant 1.000000e+00 : f32
    %93 = vector.broadcast %cst_29 : f32 to vector<8x384xf32>
    %94 = arith.addf %93, %92 : vector<8x384xf32>
    %95 = arith.divf %93, %94 : vector<8x384xf32>
    %96 = vector.extract_strided_slice %89 {offsets = [0, 384], sizes = [8, 128], strides = [1, 1]} : vector<8x512xf32> to vector<8x128xf32>
    %97 = math.tanh %96 : vector<8x128xf32>
    %98 = vector.extract_strided_slice %95 {offsets = [0, 0], sizes = [8, 128], strides = [1, 1]} : vector<8x384xf32> to vector<8x128xf32>
    %99 = vector.extract_strided_slice %95 {offsets = [0, 128], sizes = [8, 128], strides = [1, 1]} : vector<8x384xf32> to vector<8x128xf32>
    %100 = vector.extract_strided_slice %95 {offsets = [0, 256], sizes = [8, 128], strides = [1, 1]} : vector<8x384xf32> to vector<8x128xf32>
    %101 = arith.mulf %99, %79 : vector<8x128xf32>
    %102 = arith.mulf %98, %97 : vector<8x128xf32>
    %103 = arith.addf %101, %102 : vector<8x128xf32>
    %104 = math.tanh %103 : vector<8x128xf32>
    %105 = arith.mulf %100, %104 : vector<8x128xf32>
    %c4_i32 = arith.constant 4 : i32
    %106 = arith.index_cast %c4_i32 : i32 to index
    %c0_30 = arith.constant 0 : index
    %c0_31 = arith.constant 0 : index
    %107 = vector.load %arg2[%106, %c0_30, %c0_31] : memref<8x8x64xbf16, #tpu.memory_space<vmem>>, vector<1x8x64xbf16>
    %108 = vector.shape_cast %107 : vector<1x8x64xbf16> to vector<8x64xbf16>
    %cst_32 = arith.constant dense<0.000000e+00> : vector<8x512xf32>
    %109 = tpu.matmul %108, %3, %cst_32 {dimension_numbers = #tpu.dot_dimension_numbers<[1], [0], [0], [1], [0, 0, 1, 1], [], []>} : vector<8x64xbf16>, vector<64x512xbf16>, vector<8x512xf32> -> vector<8x512xf32>
    %110 = arith.truncf %105 : vector<8x128xf32> to vector<8x128xbf16>
    %cst_33 = arith.constant dense<0.000000e+00> : vector<8x512xf32>
    %111 = tpu.matmul %110, %4, %cst_33 {dimension_numbers = #tpu.dot_dimension_numbers<[1], [0], [0], [1], [0, 0, 1, 1], [], []>} : vector<8x128xbf16>, vector<128x512xbf16>, vector<8x512xf32> -> vector<8x512xf32>
    %112 = arith.addf %109, %111 : vector<8x512xf32>
    %113 = arith.addf %112, %7 : vector<8x512xf32>
    %114 = vector.extract_strided_slice %113 {offsets = [0, 0], sizes = [8, 384], strides = [1, 1]} : vector<8x512xf32> to vector<8x384xf32>
    %115 = arith.negf %114 : vector<8x384xf32>
    %116 = math.exp %115 : vector<8x384xf32>
    %cst_34 = arith.constant 1.000000e+00 : f32
    %117 = vector.broadcast %cst_34 : f32 to vector<8x384xf32>
    %118 = arith.addf %117, %116 : vector<8x384xf32>
    %119 = arith.divf %117, %118 : vector<8x384xf32>
    %120 = vector.extract_strided_slice %113 {offsets = [0, 384], sizes = [8, 128], strides = [1, 1]} : vector<8x512xf32> to vector<8x128xf32>
    %121 = math.tanh %120 : vector<8x128xf32>
    %122 = vector.extract_strided_slice %119 {offsets = [0, 0], sizes = [8, 128], strides = [1, 1]} : vector<8x384xf32> to vector<8x128xf32>
    %123 = vector.extract_strided_slice %119 {offsets = [0, 128], sizes = [8, 128], strides = [1, 1]} : vector<8x384xf32> to vector<8x128xf32>
    %124 = vector.extract_strided_slice %119 {offsets = [0, 256], sizes = [8, 128], strides = [1, 1]} : vector<8x384xf32> to vector<8x128xf32>
    %125 = arith.mulf %123, %103 : vector<8x128xf32>
    %126 = arith.mulf %122, %121 : vector<8x128xf32>
    %127 = arith.addf %125, %126 : vector<8x128xf32>
    %128 = math.tanh %127 : vector<8x128xf32>
    %129 = arith.mulf %124, %128 : vector<8x128xf32>
    %c5_i32 = arith.constant 5 : i32
    %130 = arith.index_cast %c5_i32 : i32 to index
    %c0_35 = arith.constant 0 : index
    %c0_36 = arith.constant 0 : index
    %131 = vector.load %arg2[%130, %c0_35, %c0_36] : memref<8x8x64xbf16, #tpu.memory_space<vmem>>, vector<1x8x64xbf16>
    %132 = vector.shape_cast %131 : vector<1x8x64xbf16> to vector<8x64xbf16>
    %cst_37 = arith.constant dense<0.000000e+00> : vector<8x512xf32>
    %133 = tpu.matmul %132, %3, %cst_37 {dimension_numbers = #tpu.dot_dimension_numbers<[1], [0], [0], [1], [0, 0, 1, 1], [], []>} : vector<8x64xbf16>, vector<64x512xbf16>, vector<8x512xf32> -> vector<8x512xf32>
    %134 = arith.truncf %129 : vector<8x128xf32> to vector<8x128xbf16>
    %cst_38 = arith.constant dense<0.000000e+00> : vector<8x512xf32>
    %135 = tpu.matmul %134, %4, %cst_38 {dimension_numbers = #tpu.dot_dimension_numbers<[1], [0], [0], [1], [0, 0, 1, 1], [], []>} : vector<8x128xbf16>, vector<128x512xbf16>, vector<8x512xf32> -> vector<8x512xf32>
    %136 = arith.addf %133, %135 : vector<8x512xf32>
    %137 = arith.addf %136, %7 : vector<8x512xf32>
    %138 = vector.extract_strided_slice %137 {offsets = [0, 0], sizes = [8, 384], strides = [1, 1]} : vector<8x512xf32> to vector<8x384xf32>
    %139 = arith.negf %138 : vector<8x384xf32>
    %140 = math.exp %139 : vector<8x384xf32>
    %cst_39 = arith.constant 1.000000e+00 : f32
    %141 = vector.broadcast %cst_39 : f32 to vector<8x384xf32>
    %142 = arith.addf %141, %140 : vector<8x384xf32>
    %143 = arith.divf %141, %142 : vector<8x384xf32>
    %144 = vector.extract_strided_slice %137 {offsets = [0, 384], sizes = [8, 128], strides = [1, 1]} : vector<8x512xf32> to vector<8x128xf32>
    %145 = math.tanh %144 : vector<8x128xf32>
    %146 = vector.extract_strided_slice %143 {offsets = [0, 0], sizes = [8, 128], strides = [1, 1]} : vector<8x384xf32> to vector<8x128xf32>
    %147 = vector.extract_strided_slice %143 {offsets = [0, 128], sizes = [8, 128], strides = [1, 1]} : vector<8x384xf32> to vector<8x128xf32>
    %148 = vector.extract_strided_slice %143 {offsets = [0, 256], sizes = [8, 128], strides = [1, 1]} : vector<8x384xf32> to vector<8x128xf32>
    %149 = arith.mulf %147, %127 : vector<8x128xf32>
    %150 = arith.mulf %146, %145 : vector<8x128xf32>
    %151 = arith.addf %149, %150 : vector<8x128xf32>
    %152 = math.tanh %151 : vector<8x128xf32>
    %153 = arith.mulf %148, %152 : vector<8x128xf32>
    %c6_i32 = arith.constant 6 : i32
    %154 = arith.index_cast %c6_i32 : i32 to index
    %c0_40 = arith.constant 0 : index
    %c0_41 = arith.constant 0 : index
    %155 = vector.load %arg2[%154, %c0_40, %c0_41] : memref<8x8x64xbf16, #tpu.memory_space<vmem>>, vector<1x8x64xbf16>
    %156 = vector.shape_cast %155 : vector<1x8x64xbf16> to vector<8x64xbf16>
    %cst_42 = arith.constant dense<0.000000e+00> : vector<8x512xf32>
    %157 = tpu.matmul %156, %3, %cst_42 {dimension_numbers = #tpu.dot_dimension_numbers<[1], [0], [0], [1], [0, 0, 1, 1], [], []>} : vector<8x64xbf16>, vector<64x512xbf16>, vector<8x512xf32> -> vector<8x512xf32>
    %158 = arith.truncf %153 : vector<8x128xf32> to vector<8x128xbf16>
    %cst_43 = arith.constant dense<0.000000e+00> : vector<8x512xf32>
    %159 = tpu.matmul %158, %4, %cst_43 {dimension_numbers = #tpu.dot_dimension_numbers<[1], [0], [0], [1], [0, 0, 1, 1], [], []>} : vector<8x128xbf16>, vector<128x512xbf16>, vector<8x512xf32> -> vector<8x512xf32>
    %160 = arith.addf %157, %159 : vector<8x512xf32>
    %161 = arith.addf %160, %7 : vector<8x512xf32>
    %162 = vector.extract_strided_slice %161 {offsets = [0, 0], sizes = [8, 384], strides = [1, 1]} : vector<8x512xf32> to vector<8x384xf32>
    %163 = arith.negf %162 : vector<8x384xf32>
    %164 = math.exp %163 : vector<8x384xf32>
    %cst_44 = arith.constant 1.000000e+00 : f32
    %165 = vector.broadcast %cst_44 : f32 to vector<8x384xf32>
    %166 = arith.addf %165, %164 : vector<8x384xf32>
    %167 = arith.divf %165, %166 : vector<8x384xf32>
    %168 = vector.extract_strided_slice %161 {offsets = [0, 384], sizes = [8, 128], strides = [1, 1]} : vector<8x512xf32> to vector<8x128xf32>
    %169 = math.tanh %168 : vector<8x128xf32>
    %170 = vector.extract_strided_slice %167 {offsets = [0, 0], sizes = [8, 128], strides = [1, 1]} : vector<8x384xf32> to vector<8x128xf32>
    %171 = vector.extract_strided_slice %167 {offsets = [0, 128], sizes = [8, 128], strides = [1, 1]} : vector<8x384xf32> to vector<8x128xf32>
    %172 = vector.extract_strided_slice %167 {offsets = [0, 256], sizes = [8, 128], strides = [1, 1]} : vector<8x384xf32> to vector<8x128xf32>
    %173 = arith.mulf %171, %151 : vector<8x128xf32>
    %174 = arith.mulf %170, %169 : vector<8x128xf32>
    %175 = arith.addf %173, %174 : vector<8x128xf32>
    %176 = math.tanh %175 : vector<8x128xf32>
    %177 = arith.mulf %172, %176 : vector<8x128xf32>
    %c7_i32 = arith.constant 7 : i32
    %178 = arith.index_cast %c7_i32 : i32 to index
    %c0_45 = arith.constant 0 : index
    %c0_46 = arith.constant 0 : index
    %179 = vector.load %arg2[%178, %c0_45, %c0_46] : memref<8x8x64xbf16, #tpu.memory_space<vmem>>, vector<1x8x64xbf16>
    %180 = vector.shape_cast %179 : vector<1x8x64xbf16> to vector<8x64xbf16>
    %cst_47 = arith.constant dense<0.000000e+00> : vector<8x512xf32>
    %181 = tpu.matmul %180, %3, %cst_47 {dimension_numbers = #tpu.dot_dimension_numbers<[1], [0], [0], [1], [0, 0, 1, 1], [], []>} : vector<8x64xbf16>, vector<64x512xbf16>, vector<8x512xf32> -> vector<8x512xf32>
    %182 = arith.truncf %177 : vector<8x128xf32> to vector<8x128xbf16>
    %cst_48 = arith.constant dense<0.000000e+00> : vector<8x512xf32>
    %183 = tpu.matmul %182, %4, %cst_48 {dimension_numbers = #tpu.dot_dimension_numbers<[1], [0], [0], [1], [0, 0, 1, 1], [], []>} : vector<8x128xbf16>, vector<128x512xbf16>, vector<8x512xf32> -> vector<8x512xf32>
    %184 = arith.addf %181, %183 : vector<8x512xf32>
    %185 = arith.addf %184, %7 : vector<8x512xf32>
    %186 = vector.extract_strided_slice %185 {offsets = [0, 0], sizes = [8, 384], strides = [1, 1]} : vector<8x512xf32> to vector<8x384xf32>
    %187 = arith.negf %186 : vector<8x384xf32>
    %188 = math.exp %187 : vector<8x384xf32>
    %cst_49 = arith.constant 1.000000e+00 : f32
    %189 = vector.broadcast %cst_49 : f32 to vector<8x384xf32>
    %190 = arith.addf %189, %188 : vector<8x384xf32>
    %191 = arith.divf %189, %190 : vector<8x384xf32>
    %192 = vector.extract_strided_slice %185 {offsets = [0, 384], sizes = [8, 128], strides = [1, 1]} : vector<8x512xf32> to vector<8x128xf32>
    %193 = math.tanh %192 : vector<8x128xf32>
    %194 = vector.extract_strided_slice %191 {offsets = [0, 0], sizes = [8, 128], strides = [1, 1]} : vector<8x384xf32> to vector<8x128xf32>
    %195 = vector.extract_strided_slice %191 {offsets = [0, 128], sizes = [8, 128], strides = [1, 1]} : vector<8x384xf32> to vector<8x128xf32>
    %196 = vector.extract_strided_slice %191 {offsets = [0, 256], sizes = [8, 128], strides = [1, 1]} : vector<8x384xf32> to vector<8x128xf32>
    %197 = arith.mulf %195, %175 : vector<8x128xf32>
    %198 = arith.mulf %194, %193 : vector<8x128xf32>
    %199 = arith.addf %197, %198 : vector<8x128xf32>
    %200 = math.tanh %199 : vector<8x128xf32>
    %201 = arith.mulf %196, %200 : vector<8x128xf32>
    %c8_i32 = arith.constant 8 : i32
    %c0_50 = arith.constant 0 : index
    %c0_51 = arith.constant 0 : index
    %202 = vector.load %arg9[%c0_50, %c0_51] : memref<8x128xf32, #tpu.memory_space<vmem>>, vector<8x128xf32>
    tpu.vector_store %arg9[%c0_50, %c0_51], %201 {strides = array<i32>} : memref<8x128xf32, #tpu.memory_space<vmem>>, vector<8x128xf32>,
    %c0_52 = arith.constant 0 : index
    %c0_53 = arith.constant 0 : index
    %203 = vector.load %arg10[%c0_52, %c0_53] : memref<8x128xf32, #tpu.memory_space<vmem>>, vector<8x128xf32>
    tpu.vector_store %arg10[%c0_52, %c0_53], %199 {strides = array<i32>} : memref<8x128xf32, #tpu.memory_space<vmem>>, vector<8x128xf32>,
    %c0_i32_54 = arith.constant 0 : i32
    %204 = arith.cmpi eq, %arg1, %c0_i32_54 : i32
    %205 = arith.extui %204 : i1 to i32
    %c0_i32_55 = arith.constant 0 : i32
    %206 = arith.cmpi ne, %205, %c0_i32_55 : i32
    scf.if %206 {
      %207 = arith.truncf %201 : vector<8x128xf32> to vector<8x128xbf16>
      %c0_56 = arith.constant 0 : index
      %c0_57 = arith.constant 0 : index
      %208 = vector.load %arg6[%c0_56, %c0_57] : memref<128x128xbf16, #tpu.memory_space<vmem>>, vector<128x128xbf16>
      %cst_58 = arith.constant dense<0.000000e+00> : vector<8x128xf32>
      %209 = tpu.matmul %207, %208, %cst_58 {dimension_numbers = #tpu.dot_dimension_numbers<[1], [0], [0], [1], [0, 0, 1, 1], [], []>} : vector<8x128xbf16>, vector<128x128xbf16>, vector<8x128xf32> -> vector<8x128xf32>
      %c0_59 = arith.constant 0 : index
      %c0_60 = arith.constant 0 : index
      %210 = vector.load %arg7[%c0_59, %c0_60] : memref<1x128xf32, #tpu.memory_space<vmem>>, vector<1x128xf32>
      %211 = vector.broadcast %210 : vector<1x128xf32> to vector<8x128xf32>
      %212 = arith.addf %209, %211 : vector<8x128xf32>
      %cst_61 = arith.constant dense<0xFF800000> : vector<8xf32>
      %213 = vector.multi_reduction <maximumf>, %212, %cst_61 [1] : vector<8x128xf32> to vector<8xf32>
      %cst_62 = arith.constant 0xFF800000 : f32
      %214 = vector.broadcast %cst_62 : f32 to vector<8xf32>
      %215 = arith.maximumf %214, %213 : vector<8xf32>
      %216 = vector.shape_cast %215 : vector<8xf32> to vector<8x1xf32>
      %217 = vector.broadcast %216 : vector<8x1xf32> to vector<8x128xf32>
      %218 = arith.subf %212, %217 : vector<8x128xf32>
      %219 = math.exp %218 : vector<8x128xf32>
      %cst_63 = arith.constant dense<0.000000e+00> : vector<8xf32>
      %220 = vector.multi_reduction <add>, %219, %cst_63 [1] : vector<8x128xf32> to vector<8xf32>
      %221 = vector.shape_cast %220 : vector<8xf32> to vector<8x1xf32>
      %222 = math.log %221 : vector<8x1xf32>
      %223 = vector.broadcast %222 : vector<8x1xf32> to vector<8x128xf32>
      %224 = arith.subf %218, %223 : vector<8x128xf32>
      %c0_64 = arith.constant 0 : index
      %c0_65 = arith.constant 0 : index
      %225 = vector.load %arg8[%c0_64, %c0_65] : memref<8x128xf32, #tpu.memory_space<vmem>>, vector<8x128xf32>
      tpu.vector_store %arg8[%c0_64, %c0_65], %224 {strides = array<i32>} : memref<8x128xf32, #tpu.memory_space<vmem>>, vector<8x128xf32>,
    } else {
    }
    return
  }
  func.func @transform_0(%arg0: i32, %arg1: i32) -> (i32, i32, i32) {
    %c0_i32 = arith.constant 0 : i32
    %c0_i32_0 = arith.constant 0 : i32
    return %arg1, %arg0, %c0_i32 : i32, i32, i32
  }
  func.func @transform_1(%arg0: i32, %arg1: i32) -> (i32, i32) {
    %c0_i32 = arith.constant 0 : i32
    %c0_i32_0 = arith.constant 0 : i32
    %c0_i32_1 = arith.constant 0 : i32
    return %c0_i32, %c0_i32_0 : i32, i32
  }
  func.func @transform_2(%arg0: i32, %arg1: i32) -> (i32, i32) {
    %c0_i32 = arith.constant 0 : i32
    %c0_i32_0 = arith.constant 0 : i32
    %c0_i32_1 = arith.constant 0 : i32
    return %c0_i32, %c0_i32_0 : i32, i32
  }
  func.func @transform_3(%arg0: i32, %arg1: i32) -> (i32, i32) {
    %c0_i32 = arith.constant 0 : i32
    %c0_i32_0 = arith.constant 0 : i32
    %c0_i32_1 = arith.constant 0 : i32
    return %c0_i32, %c0_i32_0 : i32, i32
  }
  func.func @transform_4(%arg0: i32, %arg1: i32) -> (i32, i32) {
    %c0_i32 = arith.constant 0 : i32
    %c0_i32_0 = arith.constant 0 : i32
    %c0_i32_1 = arith.constant 0 : i32
    return %c0_i32, %c0_i32_0 : i32, i32
  }
  func.func @transform_5(%arg0: i32, %arg1: i32) -> (i32, i32) {
    %c0_i32 = arith.constant 0 : i32
    %c0_i32_0 = arith.constant 0 : i32
    %c0_i32_1 = arith.constant 0 : i32
    return %c0_i32, %c0_i32_0 : i32, i32
  }
  func.func @transform_6(%arg0: i32, %arg1: i32) -> (i32, i32) {
    %c0_i32 = arith.constant 0 : i32
    %c0_i32_0 = arith.constant 0 : i32
    return %arg0, %c0_i32 : i32, i32
  }
}

</mosaic_0001>

<bundles_post_ra>
// kernel: tpu_custom_call.1
= control target key start
LH: loop header
LB: loop body
LE: loop exit
PB: predicated region body
PF: predicated region fallthrough
CT: control target
= control target key end

     0   :  { %11 = vsyncpa [#allocation5], 0  ;;  %s3469_s0 = inlined_call_operand.hbm [shape: bf16[8,8,64], index: 0, kind: input, shape index: {}]   ;;  %s3470_s1 = inlined_call_operand.hbm [shape: bf16[64,512], index: 1, kind: input, shape index: {}]   ;;  %s3471_s2 = inlined_call_operand.hbm [shape: bf16[128,512], index: 2, kind: input, shape index: {}]   ;;  %s3472_s3 = inlined_call_operand.vmem [shape: f32[1,512], index: 3, kind: input, shape index: {}]   ;;  %s3473_s4 = inlined_call_operand.hbm [shape: bf16[128,128], index: 4, kind: input, shape index: {}]   ;;  %s3474_s5 = inlined_call_operand.vmem [shape: f32[1,128], index: 5, kind: input, shape index: {}]   ;;  %s3475_s6 = inlined_call_operand.hbm [shape: f32[8,128], index: 6, kind: output, shape index: {}]  }
   0x1   :  { %12 = vsyncpa [#allocation8], 0 }
   0x2   :  { %13 = vsyncpa [#allocation11], 0 }
   0x3   :  { %14 = vsyncpa [#allocation6], 0  ;;  %s2644_s21 = smov [#allocation7]   ;;  %s2526_s25 = scalar_lea.hbm %s3470_s1, 2048 }
   0x4   :  { %s32_s22 = sshll.u32 %s2644_s21, 4  ;;  %p2527_p0 = scmp.ne.s32.totalorder %s3470_s1, %s2526_s25  ;;  %s33_s22 = int_to_ptr.vmem [resolvable:$true] %s32_s22 }
   0x5   :  { %p2530_p1 = scmp.lt.u32.totalorder %s2526_s25, %s3470_s1 }
   0x7   :  { %p2532_p2 = pnand %p2530_p1, %p2527_p0 }
   0x9   :  { %2535 = shalt.err (!%p2532_p2)
}
   0xa   :  { %s2536_s30 = scalar_lea.vmem %s33_s22, 2048  ;;  %p2541_p4 = scmp.lt.s32.totalorder %s33_s22, %s33_s22 }
   0xb   :  { %p2537_p3 = scmp.ne.s32.totalorder %s33_s22, %s2536_s30  ;;  %p2542_p5 = scmp.lt.s32.totalorder %s2536_s30, %s2536_s30 }
   0xd   :  { %p2543_p6 = por %p2542_p5, %p2541_p4 }
   0xf   :  { %p2544_p7 = pnand %p2543_p6, %p2537_p3 }
  0x11   :  { %2547 = shalt.err (!%p2544_p7)
}
  0x12   :  { %s2645_s7 = smov 256   ;;  %s2646_s8 = smov 16  }
  0x13   :  { %38 = dma.hbm_to_vmem [thread:$0]  %s3470_s1, 2048, %s33_s22, [#allocation8], %s2645_s7, %s2645_s7, %s2646_s8  }
  0x14   :  { %s2647_s11 = smov [#allocation4]   ;;  %s2548_s15 = scalar_lea.hbm %s3469_s0, 512 }
  0x15   :  { %s20_s12 = sshll.u32 %s2647_s11, 4  ;;  %p2549_p8 = scmp.ne.s32.totalorder %s3469_s0, %s2548_s15  ;;  %s21_s12 = int_to_ptr.vmem [resolvable:$true] %s20_s12 }
  0x16   :  { %p2552_p9 = scmp.lt.u32.totalorder %s2548_s15, %s3469_s0 }
  0x18   :  { %p2554_p10 = pnand %p2552_p9, %p2549_p8 }
  0x1a   :  { %2557 = shalt.err (!%p2554_p10)
}
  0x1b   :  { %s2558_s20 = scalar_lea.vmem %s21_s12, 512  ;;  %p2563_p12 = scmp.lt.s32.totalorder %s21_s12, %s21_s12 }
  0x1c   :  { %p2559_p11 = scmp.ne.s32.totalorder %s21_s12, %s2558_s20  ;;  %p2564_p13 = scmp.lt.s32.totalorder %s2558_s20, %s2558_s20 }
  0x1e   :  { %p2565_p0 = por %p2564_p13, %p2563_p12 }
  0x20   :  { %p2566_p1 = pnand %p2565_p0, %p2559_p11 }
  0x22   :  { %2569 = shalt.err (!%p2566_p1)
}
  0x23   :  { %s2648_s1 = smov 64   ;;  %s2649_s21 = smov 4  }
  0x24   :  { %26 = dma.hbm_to_vmem [thread:$0]  %s3469_s0, 512, %s21_s12, [#allocation5], %s2648_s1, %s2648_s1, %s2649_s21  }
  0x25   :  { %s2650_s24 = smov [#allocation9]   ;;  %s2651_s26 = smov [#allocation10]  }
  0x26   :  { %s44_s25 = sshll.u32 %s2650_s24, 4  ;;  %s58_s27 = sshll.u32 %s2651_s26, 4  ;;  %s45_s25 = int_to_ptr.vmem [resolvable:$true] %s44_s25  ;;  %s2722_s27 = int_to_ptr.vmem [resolvable:$true] %s58_s27 }
  0x27   :  { %s2570_s30 = scalar_lea.hbm %s3471_s2, 4096 }
  0x28   :  { %p2571_p2 = scmp.ne.s32.totalorder %s3471_s2, %s2570_s30  ;;  %p2574_p3 = scmp.lt.u32.totalorder %s2570_s30, %s3471_s2 }
  0x2a   :  { %p2576_p4 = pnand %p2574_p3, %p2571_p2 }
  0x2c   :  { %2579 = shalt.err (!%p2576_p4)
}
  0x2d   :  { %s2580_s0 = scalar_lea.vmem %s45_s25, 4096  ;;  %p2585_p6 = scmp.lt.s32.totalorder %s45_s25, %s45_s25 }
  0x2e   :  { %p2581_p5 = scmp.ne.s32.totalorder %s45_s25, %s2580_s0  ;;  %p2586_p7 = scmp.lt.s32.totalorder %s2580_s0, %s2580_s0 }
  0x30   :  { %p2587_p8 = por %p2586_p7, %p2585_p6 }
  0x32   :  { %p2588_p9 = pnand %p2587_p8, %p2581_p5 }
  0x34   :  { %2591 = shalt.err (!%p2588_p9)
}
  0x35   :  { %50 = dma.hbm_to_vmem [thread:$0]  %s3471_s2, 4096, %s45_s25, [#allocation8], %s2645_s7, %s2645_s7, %s2646_s8  }
  0x36   :  { %s2592_s17 = scalar_lea.hbm %s3473_s4, 1024 }
  0x37   :  { %p2593_p10 = scmp.ne.s32.totalorder %s3473_s4, %s2592_s17  ;;  %p2596_p11 = scmp.lt.u32.totalorder %s2592_s17, %s3473_s4 }
  0x39   :  { %p2598_p12 = pnand %p2596_p11, %p2593_p10 }
  0x3b   :  { %2601 = shalt.err (!%p2598_p12)
}
  0x3c   :  { %s2602_s23 = scalar_lea.vmem %s2722_s27, 1024  ;;  %p2607_p0 = scmp.lt.s32.totalorder %s2722_s27, %s2722_s27 }
  0x3d   :  { %p2603_p13 = scmp.ne.s32.totalorder %s2722_s27, %s2602_s23  ;;  %p2608_p1 = scmp.lt.s32.totalorder %s2602_s23, %s2602_s23 }
  0x3f   :  { %p2609_p2 = por %p2608_p1, %p2607_p0 }
  0x41   :  { %p2610_p3 = pnand %p2609_p2, %p2603_p13 }
  0x43   :  { %2613 = shalt.err (!%p2610_p3)
}
  0x44   :  { %64 = dma.hbm_to_vmem [thread:$0]  %s3473_s4, 1024, %s2722_s27, [#allocation11], %s2648_s1, %s2648_s1, %s2649_s21  }
  0x45   :  { %2636 = dma.done.wait [#allocation5], 512  }
  0x46   :  { %2637 = vsyncadd [#allocation5], 4294966784 }
  0x47   :  { %2638 = dma.done.wait [#allocation8], 6144  }
  0x48   :  { %2639 = vsyncadd [#allocation8], 4294961152 }
  0x49   :  { %2640 = dma.done.wait [#allocation11], 1024  }
  0x4a   :  { %2641 = vsyncadd [#allocation11], 4294966272  ;;  %v3476_v0 = vmov 0   ;;  %v2761_v1 = vld [vmem:[#allocation9 + $0xc] ss:$16 sps:$4 sm:$0xff]   ;;  %v2653_v37 = vmov 0.0|0.0   ;;  %v136_v55 = vlaneseq }
  0x4b   :  { %393 = vmatprep.mubr.bf16.mxu1 %v3476_v0  ;;  %352 = vmatprep.mubr.bf16.mxu0 %v3476_v0  ;;  %v2763_v2 = vld [vmem:[#allocation9 + $0x8] ss:$16 sps:$4 sm:$0xff]   ;;  %v2766_v3 = vld [vmem:[#allocation9 + $0x2c] ss:$16 sps:$4 sm:$0xff]   ;;  %v2774_v6 = vld [vmem:[#allocation9 + $0x4] ss:$16 sps:$4 sm:$0xff]  }
  0x4c   :  { %361 = vmatprep.subr.bf16.mxu1 %v2761_v1  ;;  %v2769_v4 = vld [vmem:[#allocation9 + $0x28] ss:$16 sps:$4 sm:$0xff]   ;;  %v2772_v5 = vld [vmem:[#allocation9 + $0x4c] ss:$16 sps:$4 sm:$0xff]   ;;  %v2776_v7 = vld [vmem:[#allocation9] ss:$16 sps:$4 sm:$0xff]   ;;  %320 = vmatprep.subr.bf16.mxu0 %v2774_v6 }
  0x4d   :  { %362 = vmatpush1.bf16.msra.mxu1 %v2763_v2  ;;  %v2779_v8 = vld [vmem:[#allocation9 + $0x48] ss:$16 sps:$4 sm:$0xff]   ;;  %v2781_v9 = vld [vmem:[#allocation9 + $0x6c] ss:$16 sps:$4 sm:$0xff]   ;;  %v2785_v10 = vld [vmem:[#allocation9 + $0x24] ss:$16 sps:$4 sm:$0xff]   ;;  %321 = vmatpush1.bf16.msra.mxu0 %v2776_v7 }
  0x4e   :  { %363 = vmatprep.subr.bf16.mxu1 %v2766_v3  ;;  %v2788_v11 = vld [vmem:[#allocation9 + $0x20] ss:$16 sps:$4 sm:$0xff]   ;;  %322 = vmatprep.subr.bf16.mxu0 %v2785_v10  ;;  %v2792_v12 = vld [vmem:[#allocation9 + $0x68] ss:$16 sps:$4 sm:$0xff]   ;;  %v2794_v13 = vld [vmem:[#allocation9 + $0x44] ss:$16 sps:$4 sm:$0xff]  }
  0x4f   :  { %v2797_v14 = vld [vmem:[#allocation9 + $0x8c] ss:$16 sps:$4 sm:$0xff]   ;;  %v2800_v15 = vld [vmem:[#allocation9 + $0x40] ss:$16 sps:$4 sm:$0xff]   ;;  %v2803_v16 = vld [vmem:[#allocation9 + $0x64] ss:$16 sps:$4 sm:$0xff]  }
  0x50   :  { %v2806_v17 = vld [vmem:[#allocation9 + $0x88] ss:$16 sps:$4 sm:$0xff]   ;;  %v2809_v18 = vld [vmem:[#allocation9 + $0xac] ss:$16 sps:$4 sm:$0xff]   ;;  %v2812_v19 = vld [vmem:[#allocation9 + $0x60] ss:$16 sps:$4 sm:$0xff]  }
  0x51   :  { %364 = vmatpush1.bf16.msra.mxu1 %v2769_v4  ;;  %323 = vmatpush1.bf16.msra.mxu0 %v2788_v11  ;;  %v2815_v20 = vld [vmem:[#allocation9 + $0x84] ss:$16 sps:$4 sm:$0xff]   ;;  %v2818_v21 = vld [vmem:[#allocation9 + $0xa8] ss:$16 sps:$4 sm:$0xff]   ;;  %v2821_v22 = vld [vmem:[#allocation9 + $0xcc] ss:$16 sps:$4 sm:$0xff]  }
  0x52   :  { %365 = vmatprep.subr.bf16.mxu1 %v2772_v5  ;;  %324 = vmatprep.subr.bf16.mxu0 %v2794_v13  ;;  %3516 = vst [vmem:[#allocation17_spill] sm:$0xff] %v2818_v21  ;;  %3517 = vst [vmem:[#allocation18_spill] sm:$0xff] %v2821_v22  ;;  %v2824_v23 = vld [vmem:[#allocation9 + $0x80] ss:$16 sps:$4 sm:$0xff]   ;;  %v2827_v24 = vld [vmem:[#allocation9 + $0xa4] ss:$16 sps:$4 sm:$0xff]  }
  0x53   :  { %v2830_v25 = vld [vmem:[#allocation9 + $0xc8] ss:$16 sps:$4 sm:$0xff]   ;;  %v2833_v26 = vld [vmem:[#allocation9 + $0xec] ss:$16 sps:$4 sm:$0xff]   ;;  %v2836_v27 = vld [vmem:[#allocation9 + $0xa0] ss:$16 sps:$4 sm:$0xff]  }
  0x54   :  { %3518 = vst [vmem:[#allocation19_spill] sm:$0xff] %v2830_v25  ;;  %3519 = vst [vmem:[#allocation20_spill] sm:$0xff] %v2833_v26  ;;  %v2839_v28 = vld [vmem:[#allocation9 + $0xc4] ss:$16 sps:$4 sm:$0xff]   ;;  %v2842_v29 = vld [vmem:[#allocation9 + $0xe8] ss:$16 sps:$4 sm:$0xff]  }
  0x55   :  { %366 = vmatpush1.bf16.msra.mxu1 %v2779_v8  ;;  %325 = vmatpush1.bf16.msra.mxu0 %v2800_v15  ;;  %3520 = vst [vmem:[#allocation21_spill] sm:$0xff] %v2836_v27  ;;  %3521 = vst [vmem:[#allocation22_spill] sm:$0xff] %v2839_v28  ;;  %v2845_v30 = vld [vmem:[#allocation7 + $0x4] ss:$16 sps:$4 sm:$0xff]   ;;  %v2848_v31 = vld [vmem:[#allocation9 + $0xc0] ss:$16 sps:$4 sm:$0xff]  }
  0x56   :  { %367 = vmatprep.subr.bf16.mxu1 %v2781_v9  ;;  %326 = vmatprep.subr.bf16.mxu0 %v2803_v16  ;;  %3522 = vst [vmem:[#allocation23_spill] sm:$0xff] %v2842_v29  ;;  %3523 = vst [vmem:[#allocation24_spill] sm:$0xff] %v2845_v30  ;;  %v2850_v32 = vld [vmem:[#allocation7] ss:$16 sps:$4 sm:$0xff]   ;;  %v2853_v33 = vld [vmem:[#allocation9 + $0xe4] ss:$16 sps:$4 sm:$0xff]  }
  0x57   :  { %3524 = vst [vmem:[#allocation25_spill] sm:$0xff] %v2848_v31  ;;  %3525 = vst [vmem:[#allocation26_spill] sm:$0xff] %v2853_v33  ;;  %v2856_v34 = vld [vmem:[#allocation7 + $0x24] ss:$16 sps:$4 sm:$0xff]   ;;  %v2859_v35 = vld [vmem:[#allocation9 + $0xe0] ss:$16 sps:$4 sm:$0xff]  }
  0x58   :  { %3526 = vst [vmem:[#allocation27_spill] sm:$0xff] %v2859_v35  ;;  %v2861_v36 = vld [vmem:[#allocation7 + $0x20] ss:$16 sps:$4 sm:$0xff]   ;;  %v2864_v38 = vld [vmem:[#allocation7 + $0x44] ss:$16 sps:$4 sm:$0xff]   ;;  %vm482_vm0 = vcmask 523264  }
  0x59   :  { %368 = vmatpush1.bf16.msra.mxu1 %v2792_v12  ;;  %327 = vmatpush1.bf16.msra.mxu0 %v2812_v19  ;;  %v2873_v39 = vld [vmem:[#allocation7 + $0x40] ss:$16 sps:$4 sm:$0xff]   ;;  %v2876_v40 = vld [vmem:[#allocation7 + $0x64] ss:$16 sps:$4 sm:$0xff]   ;;  %v2885_v42 = vld [vmem:[#allocation7 + $0xc] ss:$16 sps:$4 sm:$0xff]  }
  0x5a   :  { %369 = vmatprep.subr.bf16.mxu1 %v2797_v14  ;;  %328 = vmatprep.subr.bf16.mxu0 %v2815_v20  ;;  %v2882_v41 = vld [vmem:[#allocation7 + $0x60] ss:$16 sps:$4 sm:$0xff]   ;;  %3527 = vst [vmem:[#allocation28_spill] sm:$0xff] %v2885_v42  ;;  %v2890_v44 = vld [vmem:[#allocation7 + $0x8] ss:$16 sps:$4 sm:$0xff]   ;;  %v137_v58 = vshrl.u32 %v136_v55, 7 }
  0x5b   :  { %v158_v43 = vld [vmem:[#allocation4] sm:$0xf]  ;;  %v2893_v45 = vld [vmem:[#allocation7 + $0x2c] ss:$16 sps:$4 sm:$0xff]   ;;  %v2899_v46 = vld [vmem:[#allocation7 + $0x28] ss:$16 sps:$4 sm:$0xff]  }
  0x5c   :  { %v2903_v47 = vld [vmem:[#allocation7 + $0x4c] ss:$16 sps:$4 sm:$0xff]   ;;  %v2908_v48 = vld [vmem:[#allocation7 + $0x48] ss:$16 sps:$4 sm:$0xff]   ;;  %v138_v61 = vsub.s32 0, %v137_v58  ;;  %v142_v63 = vsub.s32 1, %v137_v58 }
  0x5d   :  { %370 = vmatpush1.bf16.msra.mxu1 %v2806_v17  ;;  %329 = vmatpush1.bf16.msra.mxu0 %v2824_v23  ;;  %v2911_v49 = vld [vmem:[#allocation7 + $0x6c] ss:$16 sps:$4 sm:$0xff]   ;;  %v2916_v50 = vld [vmem:[#allocation7 + $0x68] ss:$16 sps:$4 sm:$0xff]   ;;  %v134_v62 = vld [vmem:[%s3472_s3] sm:$0xf] }
  0x5e   :  { %371 = vmatprep.subr.bf16.mxu1 %v2809_v18  ;;  %330 = vmatprep.subr.bf16.mxu0 %v2827_v24  ;;  %vm2655_vm1 = vmmov 0   ;;  %s2656_s21 = smov [#allocation12]  }
  0x5f   :  { %s2116_s24 = sshll.u32 %s2656_s21, 4  ;;  %s2117_s24 = int_to_ptr.vmem [resolvable:$true] %s2116_s24 }
  0x60   :  { %p2619_p5 = scmp.lt.s32.totalorder %s2117_s24, %s2117_s24 }
  0x61   :  { %372 = vmatpush1.bf16.msra.mxu1 %v2818_v21  ;;  %331 = vmatpush1.bf16.msra.mxu0 %v2836_v27 }
  0x62   :  { %373 = vmatprep.subr.bf16.mxu1 %v2821_v22  ;;  %332 = vmatprep.subr.bf16.mxu0 %v2839_v28 }
  0x65   :  { %374 = vmatpush1.bf16.msra.mxu1 %v2830_v25  ;;  %333 = vmatpush1.bf16.msra.mxu0 %v2848_v31 }
  0x66   :  { %375 = vmatprep.subr.bf16.mxu1 %v2833_v26  ;;  %334 = vmatprep.subr.bf16.mxu0 %v2853_v33 }
  0x69   :  { %376 = vmatpush1.bf16.msra.mxu1 %v2842_v29  ;;  %335 = vmatpush1.bf16.msra.mxu0 %v2859_v35 }
  0x6a   :  { %486 = vmatprep.subr.bf16.mxu1 %v2845_v30  ;;  %599 = vmatprep.subr.bf16.mxu0 %v2774_v6 }
  0x6c   :  { %394 = vmatmul.mubr.bf16.vlgmr.msra.gmra.mrb[0].mxu1 %v2653_v37  ;;  %353 = vmatmul.mubr.bf16.vlgmr.msra.gmra.mrb[0].mxu0 %v2653_v37  ;;  %v2948_v37 = vrot.slane %v134_v62, %v138_v61 }
  0x6d   :  { %487 = vmatpush1.bf16.msra.mxu1 %v2850_v32  ;;  %518 = vmatprep.mubr.bf16.mxu1 %v3476_v0 }
  0x6e   :  { %488 = vmatprep.subr.bf16.mxu1 %v2856_v34  ;;  %600 = vmatpush1.bf16.msra.mxu0 %v2776_v7  ;;  %3528 = vst [vmem:[#allocation29_spill] sm:$0xff] %v2948_v37 }
  0x6f   :  { %631 = vmatprep.mubr.bf16.mxu0 %v3476_v0  ;;  %601 = vmatprep.subr.bf16.mxu0 %v2785_v10 }
  0x71   :  { %489 = vmatpush1.bf16.msra.mxu1 %v2861_v36 }
  0x72   :  { %490 = vmatprep.subr.bf16.mxu1 %v2864_v38  ;;  %602 = vmatpush1.bf16.msra.mxu0 %v2788_v11 }
  0x73   :  { %603 = vmatprep.subr.bf16.mxu0 %v2794_v13 }
  0x75   :  { %491 = vmatpush1.bf16.msra.mxu1 %v2873_v39 }
  0x76   :  { %492 = vmatprep.subr.bf16.mxu1 %v2876_v40  ;;  %604 = vmatpush1.bf16.msra.mxu0 %v2800_v15 }
  0x77   :  { %605 = vmatprep.subr.bf16.mxu0 %v2803_v16 }
  0x79   :  { %493 = vmatpush1.bf16.msra.mxu1 %v2882_v41 }
  0x7a   :  { %527 = vmatprep.subr.bf16.mxu1 %v2885_v42  ;;  %606 = vmatpush1.bf16.msra.mxu0 %v2812_v19 }
  0x7b   :  { %607 = vmatprep.subr.bf16.mxu0 %v2815_v20 }
  0x7c   :  { %2175 = vmatmul.mubr.msk.bf16.vlgmr.msra.gmra.mrb[4].mxu1 %vm482_vm0, %v158_v43 }
  0x7d   :  { %528 = vmatpush1.bf16.msra.mxu1 %v2890_v44  ;;  %559 = vmatprep.mubr.bf16.mxu1 %v3476_v0 }
  0x7e   :  { %529 = vmatprep.subr.bf16.mxu1 %v2893_v45  ;;  %608 = vmatpush1.bf16.msra.mxu0 %v2824_v23 }
  0x7f   :  { %609 = vmatprep.subr.bf16.mxu0 %v2827_v24 }
  0x81   :  { %530 = vmatpush1.bf16.msra.mxu1 %v2899_v46 }
  0x82   :  { %531 = vmatprep.subr.bf16.mxu1 %v2903_v47  ;;  %610 = vmatpush1.bf16.msra.mxu0 %v2836_v27 }
  0x83   :  { %611 = vmatprep.subr.bf16.mxu0 %v2839_v28 }
  0x85   :  { %532 = vmatpush1.bf16.msra.mxu1 %v2908_v48 }
  0x86   :  { %533 = vmatprep.subr.bf16.mxu1 %v2911_v49  ;;  %612 = vmatpush1.bf16.msra.mxu0 %v2848_v31 }
  0x87   :  { %613 = vmatprep.subr.bf16.mxu0 %v2853_v33  ;;  %v150_v33 = vsub.s32 3, %v137_v58 }
  0x89   :  { %534 = vmatpush1.bf16.msra.mxu1 %v2916_v50 }
  0x8a   :  { %640 = vmatprep.subr.bf16.mxu1 %v2761_v1  ;;  %614 = vmatpush1.bf16.msra.mxu0 %v2859_v35 }
  0x8b   :  { %684 = vmatprep.subr.bf16.mxu0 %v2845_v30 }
  0x8c   :  { %2176 = vmatmul.mubr.msk.bf16.vlgmr.msra.gmra.mrb[8].mxu1 %vm482_vm0, %v158_v43 }
  0x8d   :  { %641 = vmatpush1.bf16.msra.mxu1 %v2763_v2  ;;  %672 = vmatprep.mubr.bf16.mxu1 %v3476_v0  ;;  %v2950_v0 = vrot.slane %v134_v62, %v142_v63  ;;  %v2956_v63 = vrot.slane %v134_v62, %v150_v33 }
  0x8e   :  { %642 = vmatprep.subr.bf16.mxu1 %v2766_v3 }
  0x91   :  { %643 = vmatpush1.bf16.msra.mxu1 %v2769_v4 }
  0x92   :  { %644 = vmatprep.subr.bf16.mxu1 %v2772_v5 }
  0x95   :  { %645 = vmatpush1.bf16.msra.mxu1 %v2779_v8 }
  0x96   :  { %646 = vmatprep.subr.bf16.mxu1 %v2781_v9 }
  0x99   :  { %647 = vmatpush1.bf16.msra.mxu1 %v2792_v12 }
  0x9a   :  { %648 = vmatprep.subr.bf16.mxu1 %v2797_v14 }
  0x9d   :  { %649 = vmatpush1.bf16.msra.mxu1 %v2806_v17 }
  0x9e   :  { %650 = vmatprep.subr.bf16.mxu1 %v2809_v18 }
  0xa1   :  { %651 = vmatpush1.bf16.msra.mxu1 %v2818_v21 }
  0xa2   :  { %652 = vmatprep.subr.bf16.mxu1 %v2821_v22 }
  0xa5   :  { %653 = vmatpush1.bf16.msra.mxu1 %v2830_v25 }
  0xa6   :  { %654 = vmatprep.subr.bf16.mxu1 %v2833_v26  ;;  %v146_v26 = vsub.s32 2, %v137_v58 }
  0xa8   :  { %v2954_v61 = vrot.slane %v134_v62, %v146_v26 }
  0xa9   :  { %655 = vmatpush1.bf16.msra.mxu1 %v2842_v29 }
  0xaa   :  { %725 = vmatprep.subr.bf16.mxu1 %v2885_v42 }
 0x13f   :  { %v395_v51 = vpop.f32.mrb[0].mxu1  ;;  %v354_v56 = vpop.f32.mrb[0].mxu0 }
 0x140   :  { %v397_v52 = vpop.f32.mrb[1].mxu1  ;;  %v356_v57 = vpop.f32.mrb[1].mxu0 }
 0x141   :  { %v399_v53 = vpop.f32.mrb[2].mxu1  ;;  %v358_v59 = vpop.f32.mrb[2].mxu0 }
 0x142   :  { %v400_v54 = vpop.f32.mrb[3].mxu1  ;;  %v359_v60 = vpop.f32.mrb[3].mxu0 }
 0x14f   :  { %v520_v43 = vpop.f32.mrb[4].mxu1 }
 0x150   :  { %v521_v42 = vadd.f32 %v520_v43, %v354_v56  ;;  %v522_v53 = vpop.f32.mrb[5].mxu1 }
 0x151   :  { %v523_v54 = vadd.f32 %v522_v53, %v356_v57  ;;  %v524_v30 = vpop.f32.mrb[6].mxu1 }
 0x152   :  { %v568_v29 = vadd.f32 %v521_v42, %v2948_v37  ;;  %v525_v55 = vpop.f32.mrb[7].mxu1 }
 0x153   :  { %v569_v59 = vadd.f32 %v523_v54, %v2950_v0 }
 0x154   :  { %v2177_v60 = vmul.f32 -1.442695, %v568_v29 }
 0x155   :  { %v2178_v35 = vmul.f32 -1.442695, %v569_v59 }
 0x156   :  { %2346 = vpow2.f32 %v2177_v60 }
 0x157   :  { %2348 = vpow2.f32 %v2178_v35 }
 0x15f   :  { %v561_v25 = vpop.f32.mrb[8].mxu1 }
 0x160   :  { %v2347_v56 = vpop.eup %2346  ;;  %v562_v43 = vadd.f32 %v561_v25, %v395_v51  ;;  %v563_v57 = vpop.f32.mrb[9].mxu1 }
 0x161   :  { %v2349_v30 = vpop.eup %2348  ;;  %v581_v53 = vadd.f32 1.0, %v2347_v56  ;;  %v564_v42 = vadd.f32 %v563_v57, %v397_v52  ;;  %v565_v55 = vpop.f32.mrb[10].mxu1 }
 0x162   :  { %v582_v37 = vadd.f32 1.0, %v2349_v30  ;;  %v570_v29 = vadd.f32 %v562_v43, %v2954_v61  ;;  %v566_v54 = vpop.f32.mrb[11].mxu1  ;;  %v3531_v55 = vld [vmem:[#allocation26_spill] sm:$0xff] }
 0x163   :  { %2350 = vrcp.f32 %v581_v53  ;;  %v571_v35 = vadd.f32 %v564_v42, %v2956_v63  ;;  %v597_v53 = vld [vmem:[#allocation4 + $0x4] sm:$0xf]  ;;  %v3530_v42 = vld [vmem:[#allocation19_spill] sm:$0xff] }
 0x164   :  { %2352 = vrcp.f32 %v582_v37  ;;  %v2179_v26 = vmul.f32 -1.442695, %v570_v29  ;;  %v3529_v37 = vmov 0   ;;  %v3532_v29 = vld [vmem:[#allocation20_spill] sm:$0xff]  ;;  %v3533_v54 = vld [vmem:[#allocation27_spill] sm:$0xff] }
 0x165   :  { %2354 = vtanh.f32 %v571_v35  ;;  %v3534_v35 = vld [vmem:[#allocation23_spill] sm:$0xff] }
 0x166   :  { %2356 = vpow2.f32 %v2179_v26  ;;  %v3535_v26 = vld [vmem:[#allocation24_spill] sm:$0xff] }
 0x16d   :  { %v2351_v33 = vpop.eup %2350 }
 0x16e   :  { %v2353_v58 = vpop.eup %2352 }
 0x16f   :  { %v2355_v62 = vpop.eup %2354  ;;  %v591_v25 = vmul.f32 0.0, %v2353_v58 }
 0x170   :  { %v2357_v51 = vpop.eup %2356  ;;  %v592_v59 = vmul.f32 %v2355_v62, %v2351_v33  ;;  %v3536_v33 = vld [vmem:[#allocation28_spill] sm:$0xff] }
 0x171   :  { %v583_v60 = vadd.f32 1.0, %v2357_v51 }
 0x172   :  { %v2960_v52 = vadd.f32 %v592_v59, %v591_v25 }
 0x173   :  { %2358 = vrcp.f32 %v583_v60 }
 0x174   :  { %2360 = vtanh.f32 %v2960_v52 }
 0x17d   :  { %v2359_v56 = vpop.eup %2358 }
 0x17e   :  { %v2361_v43 = vpop.eup %2360 }
 0x17f   :  { %v595_v57 = vmul.f32 %v2361_v43, %v2359_v56 }
 0x181   :  { %v598_v30 = vpack.c.bf16 %v595_v57, %v595_v57 }
 0x183   :  { %632 = vmatmul.mubr.bf16.vlgmr.msra.gmra.mrb[4].mxu0 %v598_v30  ;;  %673 = vmatmul.mubr.bf16.vlgmr.msra.gmra.mrb[12].mxu1 %v598_v30 }
 0x184   :  { %685 = vmatpush1.bf16.msra.mxu0 %v2850_v32  ;;  %726 = vmatpush1.bf16.msra.mxu1 %v2890_v44 }
 0x185   :  { %686 = vmatprep.subr.bf16.mxu0 %v2856_v34  ;;  %727 = vmatprep.subr.bf16.mxu1 %v2893_v45 }
 0x186   :  { %716 = vmatprep.mubr.bf16.mxu0 %v3529_v37  ;;  %757 = vmatprep.mubr.bf16.mxu1 %v3529_v37 }
 0x188   :  { %687 = vmatpush1.bf16.msra.mxu0 %v2861_v36  ;;  %728 = vmatpush1.bf16.msra.mxu1 %v2899_v46 }
 0x189   :  { %688 = vmatprep.subr.bf16.mxu0 %v2864_v38  ;;  %729 = vmatprep.subr.bf16.mxu1 %v2903_v47 }
 0x18c   :  { %689 = vmatpush1.bf16.msra.mxu0 %v2873_v39  ;;  %730 = vmatpush1.bf16.msra.mxu1 %v2908_v48 }
 0x18d   :  { %690 = vmatprep.subr.bf16.mxu0 %v2876_v40  ;;  %731 = vmatprep.subr.bf16.mxu1 %v2911_v49 }
 0x190   :  { %691 = vmatpush1.bf16.msra.mxu0 %v2882_v41  ;;  %732 = vmatpush1.bf16.msra.mxu1 %v2916_v50 }
 0x191   :  { %797 = vmatprep.subr.bf16.mxu0 %v2774_v6  ;;  %838 = vmatprep.subr.bf16.mxu1 %v2761_v1 }
 0x193   :  { %2180 = vmatmul.mubr.msk.bf16.vlgmr.msra.gmra.mrb[8].mxu0 %vm482_vm0, %v597_v53  ;;  %2181 = vmatmul.mubr.msk.bf16.vlgmr.msra.gmra.mrb[16].mxu1 %vm482_vm0, %v597_v53 }
 0x194   :  { %798 = vmatpush1.bf16.msra.mxu0 %v2776_v7  ;;  %839 = vmatpush1.bf16.msra.mxu1 %v2763_v2 }
 0x195   :  { %799 = vmatprep.subr.bf16.mxu0 %v2785_v10  ;;  %840 = vmatprep.subr.bf16.mxu1 %v2766_v3 }
 0x196   :  { %829 = vmatprep.mubr.bf16.mxu0 %v3529_v37  ;;  %870 = vmatprep.mubr.bf16.mxu1 %v3529_v37 }
 0x198   :  { %800 = vmatpush1.bf16.msra.mxu0 %v2788_v11  ;;  %841 = vmatpush1.bf16.msra.mxu1 %v2769_v4 }
 0x199   :  { %801 = vmatprep.subr.bf16.mxu0 %v2794_v13  ;;  %842 = vmatprep.subr.bf16.mxu1 %v2772_v5 }
 0x19c   :  { %802 = vmatpush1.bf16.msra.mxu0 %v2800_v15  ;;  %843 = vmatpush1.bf16.msra.mxu1 %v2779_v8 }
 0x19d   :  { %803 = vmatprep.subr.bf16.mxu0 %v2803_v16  ;;  %844 = vmatprep.subr.bf16.mxu1 %v2781_v9 }
 0x1a0   :  { %804 = vmatpush1.bf16.msra.mxu0 %v2812_v19  ;;  %845 = vmatpush1.bf16.msra.mxu1 %v2792_v12 }
 0x1a1   :  { %805 = vmatprep.subr.bf16.mxu0 %v2815_v20  ;;  %846 = vmatprep.subr.bf16.mxu1 %v2797_v14 }
 0x1a4   :  { %806 = vmatpush1.bf16.msra.mxu0 %v2824_v23  ;;  %847 = vmatpush1.bf16.msra.mxu1 %v2806_v17 }
 0x1a5   :  { %807 = vmatprep.subr.bf16.mxu0 %v2827_v24  ;;  %848 = vmatprep.subr.bf16.mxu1 %v2809_v18 }
 0x1a8   :  { %808 = vmatpush1.bf16.msra.mxu0 %v2836_v27  ;;  %849 = vmatpush1.bf16.msra.mxu1 %v2818_v21 }
 0x1a9   :  { %809 = vmatprep.subr.bf16.mxu0 %v2839_v28  ;;  %850 = vmatprep.subr.bf16.mxu1 %v2821_v22  ;;  %v3537_v22 = vld [vmem:[#allocation29_spill] sm:$0xff] }
 0x1ac   :  { %810 = vmatpush1.bf16.msra.mxu0 %v2848_v31  ;;  %851 = vmatpush1.bf16.msra.mxu1 %v3530_v42 }
 0x1ad   :  { %811 = vmatprep.subr.bf16.mxu0 %v3531_v55  ;;  %852 = vmatprep.subr.bf16.mxu1 %v3532_v29 }
 0x1b0   :  { %812 = vmatpush1.bf16.msra.mxu0 %v3533_v54  ;;  %853 = vmatpush1.bf16.msra.mxu1 %v3534_v35 }
 0x1b1   :  { %882 = vmatprep.subr.bf16.mxu0 %v3535_v26  ;;  %923 = vmatprep.subr.bf16.mxu1 %v3536_v33 }
 0x256   :  { %v633_v58 = vpop.f32.mrb[4].mxu0  ;;  %v674_v62 = vpop.f32.mrb[12].mxu1 }
 0x257   :  { %v635_v25 = vpop.f32.mrb[5].mxu0  ;;  %v676_v51 = vpop.f32.mrb[13].mxu1 }
 0x258   :  { %v637_v59 = vpop.f32.mrb[6].mxu0  ;;  %v678_v60 = vpop.f32.mrb[14].mxu1 }
 0x259   :  { %v638_v56 = vpop.f32.mrb[7].mxu0  ;;  %v679_v43 = vpop.f32.mrb[15].mxu1 }
 0x266   :  { %v718_v57 = vpop.f32.mrb[8].mxu0  ;;  %v759_v30 = vpop.f32.mrb[16].mxu1 }
 0x267   :  { %v719_v53 = vadd.f32 %v718_v57, %v633_v58  ;;  %v760_v29 = vadd.f32 %v759_v30, %v674_v62  ;;  %v720_v55 = vpop.f32.mrb[9].mxu0  ;;  %v761_v54 = vpop.f32.mrb[17].mxu1 }
 0x268   :  { %v721_v42 = vadd.f32 %v720_v55, %v635_v25  ;;  %v762_v35 = vadd.f32 %v761_v54, %v676_v51  ;;  %v722_v31 = vpop.f32.mrb[10].mxu0  ;;  %v763_v26 = vpop.f32.mrb[18].mxu1 }
 0x269   :  { %v766_v33 = vadd.f32 %v719_v53, %v3537_v22  ;;  %v723_v28 = vpop.f32.mrb[11].mxu0  ;;  %v764_v21 = vpop.f32.mrb[19].mxu1  ;;  %v768_v56 = vadd.f32 %v760_v29, %v2954_v61  ;;  %v3538_v53 = vld [vmem:[#allocation21_spill] sm:$0xff] }
 0x26a   :  { %v767_v27 = vadd.f32 %v721_v42, %v2950_v0  ;;  %v769_v58 = vadd.f32 %v762_v35, %v2956_v63 }
 0x26b   :  { %v2182_v59 = vmul.f32 -1.442695, %v766_v33  ;;  %v2184_v62 = vmul.f32 -1.442695, %v768_v56  ;;  %v3541_v56 = vld [vmem:[#allocation18_spill] sm:$0xff] }
 0x26c   :  { %v2183_v60 = vmul.f32 -1.442695, %v767_v27 }
 0x26d   :  { %2362 = vpow2.f32 %v2182_v59  ;;  %v3539_v59 = vld [vmem:[#allocation17_spill] sm:$0xff] }
 0x26e   :  { %2364 = vpow2.f32 %v2183_v60  ;;  %v3540_v60 = vld [vmem:[#allocation22_spill] sm:$0xff] }
 0x26f   :  { %2366 = vtanh.f32 %v769_v58  ;;  %v3542_v58 = vld [vmem:[#allocation25_spill] sm:$0xff] }
 0x270   :  { %2368 = vpow2.f32 %v2184_v62  ;;  %v3543_v62 = vld [vmem:[#allocation19_spill] sm:$0xff] }
 0x277   :  { %v2363_v43 = vpop.eup %2362 }
 0x278   :  { %v779_v55 = vadd.f32 1.0, %v2363_v43  ;;  %v2365_v31 = vpop.eup %2364  ;;  %v3544_v43 = vld [vmem:[#allocation26_spill] sm:$0xff] }
 0x279   :  { %v780_v54 = vadd.f32 1.0, %v2365_v31  ;;  %v2367_v21 = vpop.eup %2366  ;;  %v3546_v31 = vld [vmem:[#allocation27_spill] sm:$0xff] }
 0x27a   :  { %2370 = vrcp.f32 %v779_v55  ;;  %v2369_v28 = vpop.eup %2368  ;;  %v3545_v55 = vld [vmem:[#allocation20_spill] sm:$0xff] }
 0x27b   :  { %2372 = vrcp.f32 %v780_v54  ;;  %v781_v33 = vadd.f32 1.0, %v2369_v28  ;;  %v3547_v54 = vld [vmem:[#allocation23_spill] sm:$0xff]  ;;  %v3549_v28 = vld [vmem:[#allocation28_spill] sm:$0xff] }
 0x27d   :  { %2374 = vrcp.f32 %v781_v33 }
 0x284   :  { %v2371_v42 = vpop.eup %2370 }
 0x285   :  { %v790_v26 = vmul.f32 %v2371_v42, %v2367_v21  ;;  %v2373_v27 = vpop.eup %2372  ;;  %v3548_v21 = vld [vmem:[#allocation24_spill] sm:$0xff] }
 0x286   :  { %v789_v25 = vmul.f32 %v2373_v27, %v2960_v52  ;;  %v795_v52 = vld [vmem:[#allocation4 + $0x8] sm:$0xf] }
 0x287   :  { %v2375_v35 = vpop.eup %2374 }
 0x288   :  { %v3022_v29 = vadd.f32 %v790_v26, %v789_v25 }
 0x28a   :  { %2376 = vtanh.f32 %v3022_v29 }
 0x294   :  { %v2377_v51 = vpop.eup %2376 }
 0x295   :  { %v793_v57 = vmul.f32 %v2377_v51, %v2375_v35 }
 0x297   :  { %v796_v30 = vpack.c.bf16 %v793_v57, %v793_v57 }
 0x299   :  { %830 = vmatmul.mubr.bf16.vlgmr.msra.gmra.mrb[12].mxu0 %v796_v30  ;;  %871 = vmatmul.mubr.bf16.vlgmr.msra.gmra.mrb[20].mxu1 %v796_v30 }
 0x29a   :  { %883 = vmatpush1.bf16.msra.mxu0 %v2850_v32  ;;  %924 = vmatpush1.bf16.msra.mxu1 %v2890_v44 }
 0x29b   :  { %884 = vmatprep.subr.bf16.mxu0 %v2856_v34  ;;  %925 = vmatprep.subr.bf16.mxu1 %v2893_v45 }
 0x29c   :  { %914 = vmatprep.mubr.bf16.mxu0 %v3529_v37  ;;  %955 = vmatprep.mubr.bf16.mxu1 %v3529_v37 }
 0x29e   :  { %885 = vmatpush1.bf16.msra.mxu0 %v2861_v36  ;;  %926 = vmatpush1.bf16.msra.mxu1 %v2899_v46 }
 0x29f   :  { %886 = vmatprep.subr.bf16.mxu0 %v2864_v38  ;;  %927 = vmatprep.subr.bf16.mxu1 %v2903_v47 }
 0x2a2   :  { %887 = vmatpush1.bf16.msra.mxu0 %v2873_v39  ;;  %928 = vmatpush1.bf16.msra.mxu1 %v2908_v48 }
 0x2a3   :  { %888 = vmatprep.subr.bf16.mxu0 %v2876_v40  ;;  %929 = vmatprep.subr.bf16.mxu1 %v2911_v49 }
 0x2a6   :  { %889 = vmatpush1.bf16.msra.mxu0 %v2882_v41  ;;  %930 = vmatpush1.bf16.msra.mxu1 %v2916_v50 }
 0x2a7   :  { %995 = vmatprep.subr.bf16.mxu0 %v2774_v6  ;;  %1036 = vmatprep.subr.bf16.mxu1 %v2761_v1 }
 0x2a9   :  { %2185 = vmatmul.mubr.msk.bf16.vlgmr.msra.gmra.mrb[16].mxu0 %vm482_vm0, %v795_v52  ;;  %2186 = vmatmul.mubr.msk.bf16.vlgmr.msra.gmra.mrb[24].mxu1 %vm482_vm0, %v795_v52 }
 0x2aa   :  { %996 = vmatpush1.bf16.msra.mxu0 %v2776_v7  ;;  %1037 = vmatpush1.bf16.msra.mxu1 %v2763_v2 }
 0x2ab   :  { %997 = vmatprep.subr.bf16.mxu0 %v2785_v10  ;;  %1038 = vmatprep.subr.bf16.mxu1 %v2766_v3 }
 0x2ac   :  { %1027 = vmatprep.mubr.bf16.mxu0 %v3529_v37  ;;  %1068 = vmatprep.mubr.bf16.mxu1 %v3529_v37 }
 0x2ae   :  { %998 = vmatpush1.bf16.msra.mxu0 %v2788_v11  ;;  %1039 = vmatpush1.bf16.msra.mxu1 %v2769_v4 }
 0x2af   :  { %999 = vmatprep.subr.bf16.mxu0 %v2794_v13  ;;  %1040 = vmatprep.subr.bf16.mxu1 %v2772_v5 }
 0x2b2   :  { %1000 = vmatpush1.bf16.msra.mxu0 %v2800_v15  ;;  %1041 = vmatpush1.bf16.msra.mxu1 %v2779_v8 }
 0x2b3   :  { %1001 = vmatprep.subr.bf16.mxu0 %v2803_v16  ;;  %1042 = vmatprep.subr.bf16.mxu1 %v2781_v9 }
 0x2b6   :  { %1002 = vmatpush1.bf16.msra.mxu0 %v2812_v19  ;;  %1043 = vmatpush1.bf16.msra.mxu1 %v2792_v12 }
 0x2b7   :  { %1003 = vmatprep.subr.bf16.mxu0 %v2815_v20  ;;  %1044 = vmatprep.subr.bf16.mxu1 %v2797_v14 }
 0x2ba   :  { %1004 = vmatpush1.bf16.msra.mxu0 %v2824_v23  ;;  %1045 = vmatpush1.bf16.msra.mxu1 %v2806_v17 }
 0x2bb   :  { %1005 = vmatprep.subr.bf16.mxu0 %v2827_v24  ;;  %1046 = vmatprep.subr.bf16.mxu1 %v2809_v18 }
 0x2be   :  { %1006 = vmatpush1.bf16.msra.mxu0 %v3538_v53  ;;  %1047 = vmatpush1.bf16.msra.mxu1 %v3539_v59 }
 0x2bf   :  { %1007 = vmatprep.subr.bf16.mxu0 %v3540_v60  ;;  %1048 = vmatprep.subr.bf16.mxu1 %v3541_v56 }
 0x2c2   :  { %1008 = vmatpush1.bf16.msra.mxu0 %v3542_v58  ;;  %1049 = vmatpush1.bf16.msra.mxu1 %v3543_v62 }
 0x2c3   :  { %1009 = vmatprep.subr.bf16.mxu0 %v3544_v43  ;;  %1050 = vmatprep.subr.bf16.mxu1 %v3545_v55 }
 0x2c6   :  { %1010 = vmatpush1.bf16.msra.mxu0 %v3546_v31  ;;  %1051 = vmatpush1.bf16.msra.mxu1 %v3547_v54 }
 0x2c7   :  { %1080 = vmatprep.subr.bf16.mxu0 %v3548_v21  ;;  %1121 = vmatprep.subr.bf16.mxu1 %v3549_v28 }
 0x36c   :  { %v831_v42 = vpop.f32.mrb[12].mxu0  ;;  %v872_v26 = vpop.f32.mrb[20].mxu1 }
 0x36d   :  { %v833_v27 = vpop.f32.mrb[13].mxu0  ;;  %v874_v33 = vpop.f32.mrb[21].mxu1 }
 0x36e   :  { %v835_v25 = vpop.f32.mrb[14].mxu0  ;;  %v876_v35 = vpop.f32.mrb[22].mxu1 }
 0x36f   :  { %v836_v51 = vpop.f32.mrb[15].mxu0  ;;  %v877_v57 = vpop.f32.mrb[23].mxu1 }
 0x37c   :  { %v916_v30 = vpop.f32.mrb[16].mxu0  ;;  %v957_v52 = vpop.f32.mrb[24].mxu1 }
 0x37d   :  { %v917_v43 = vadd.f32 %v916_v30, %v831_v42  ;;  %v958_v55 = vadd.f32 %v957_v52, %v872_v26  ;;  %v918_v62 = vpop.f32.mrb[17].mxu0  ;;  %v959_v31 = vpop.f32.mrb[25].mxu1 }
 0x37e   :  { %v919_v58 = vadd.f32 %v918_v62, %v833_v27  ;;  %v960_v54 = vadd.f32 %v959_v31, %v874_v33  ;;  %v920_v56 = vpop.f32.mrb[18].mxu0  ;;  %v961_v21 = vpop.f32.mrb[26].mxu1 }
 0x37f   :  { %v964_v28 = vadd.f32 %v917_v43, %v3537_v22  ;;  %v921_v60 = vpop.f32.mrb[19].mxu0  ;;  %v962_v59 = vpop.f32.mrb[27].mxu1  ;;  %v966_v51 = vadd.f32 %v958_v55, %v2954_v61 }
 0x380   :  { %v965_v53 = vadd.f32 %v919_v58, %v2950_v0  ;;  %v967_v42 = vadd.f32 %v960_v54, %v2956_v63 }
 0x381   :  { %v2187_v25 = vmul.f32 -1.442695, %v964_v28  ;;  %v2189_v26 = vmul.f32 -1.442695, %v966_v51 }
 0x382   :  { %v2188_v35 = vmul.f32 -1.442695, %v965_v53 }
 0x383   :  { %2378 = vpow2.f32 %v2187_v25 }
 0x384   :  { %2380 = vpow2.f32 %v2188_v35 }
 0x385   :  { %2382 = vtanh.f32 %v967_v42 }
 0x386   :  { %2384 = vpow2.f32 %v2189_v26 }
 0x38d   :  { %v2379_v57 = vpop.eup %2378 }
 0x38e   :  { %v977_v62 = vadd.f32 1.0, %v2379_v57  ;;  %v2381_v56 = vpop.eup %2380 }
 0x38f   :  { %v978_v43 = vadd.f32 1.0, %v2381_v56  ;;  %v2383_v59 = vpop.eup %2382 }
 0x390   :  { %2386 = vrcp.f32 %v977_v62  ;;  %v2385_v60 = vpop.eup %2384 }
 0x391   :  { %2388 = vrcp.f32 %v978_v43  ;;  %v979_v21 = vadd.f32 1.0, %v2385_v60 }
 0x393   :  { %2390 = vrcp.f32 %v979_v21 }
 0x39a   :  { %v2387_v58 = vpop.eup %2386 }
 0x39b   :  { %v988_v31 = vmul.f32 %v2387_v58, %v2383_v59  ;;  %v2389_v53 = vpop.eup %2388 }
 0x39c   :  { %v987_v28 = vmul.f32 %v2389_v53, %v3022_v29  ;;  %v993_v29 = vld [vmem:[#allocation4 + $0xc] sm:$0xf] }
 0x39d   :  { %v2391_v54 = vpop.eup %2390 }
 0x39e   :  { %v3084_v55 = vadd.f32 %v988_v31, %v987_v28 }
 0x3a0   :  { %2392 = vtanh.f32 %v3084_v55 }
 0x3aa   :  { %v2393_v27 = vpop.eup %2392 }
 0x3ab   :  { %v991_v33 = vmul.f32 %v2393_v27, %v2391_v54 }
 0x3ad   :  { %v994_v30 = vpack.c.bf16 %v991_v33, %v991_v33 }
 0x3af   :  { %1028 = vmatmul.mubr.bf16.vlgmr.msra.gmra.mrb[20].mxu0 %v994_v30  ;;  %1069 = vmatmul.mubr.bf16.vlgmr.msra.gmra.mrb[28].mxu1 %v994_v30 }
 0x3b0   :  { %1081 = vmatpush1.bf16.msra.mxu0 %v2850_v32  ;;  %1122 = vmatpush1.bf16.msra.mxu1 %v2890_v44 }
 0x3b1   :  { %1082 = vmatprep.subr.bf16.mxu0 %v2856_v34  ;;  %1123 = vmatprep.subr.bf16.mxu1 %v2893_v45 }
 0x3b2   :  { %1112 = vmatprep.mubr.bf16.mxu0 %v3529_v37  ;;  %1153 = vmatprep.mubr.bf16.mxu1 %v3529_v37 }
 0x3b4   :  { %1083 = vmatpush1.bf16.msra.mxu0 %v2861_v36  ;;  %1124 = vmatpush1.bf16.msra.mxu1 %v2899_v46 }
 0x3b5   :  { %1084 = vmatprep.subr.bf16.mxu0 %v2864_v38  ;;  %1125 = vmatprep.subr.bf16.mxu1 %v2903_v47 }
 0x3b8   :  { %1085 = vmatpush1.bf16.msra.mxu0 %v2873_v39  ;;  %1126 = vmatpush1.bf16.msra.mxu1 %v2908_v48 }
 0x3b9   :  { %1086 = vmatprep.subr.bf16.mxu0 %v2876_v40  ;;  %1127 = vmatprep.subr.bf16.mxu1 %v2911_v49 }
 0x3bc   :  { %1087 = vmatpush1.bf16.msra.mxu0 %v2882_v41  ;;  %1128 = vmatpush1.bf16.msra.mxu1 %v2916_v50 }
 0x3bd   :  { %1193 = vmatprep.subr.bf16.mxu0 %v2774_v6  ;;  %1234 = vmatprep.subr.bf16.mxu1 %v2761_v1  ;;  %v3550_v1 = vld [vmem:[#allocation21_spill] sm:$0xff]  ;;  %v3555_v6 = vld [vmem:[#allocation19_spill] sm:$0xff] }
 0x3bf   :  { %2190 = vmatmul.mubr.msk.bf16.vlgmr.msra.gmra.mrb[24].mxu0 %vm482_vm0, %v993_v29  ;;  %2191 = vmatmul.mubr.msk.bf16.vlgmr.msra.gmra.mrb[32].mxu1 %vm482_vm0, %v993_v29 }
 0x3c0   :  { %1194 = vmatpush1.bf16.msra.mxu0 %v2776_v7  ;;  %1235 = vmatpush1.bf16.msra.mxu1 %v2763_v2  ;;  %v3551_v2 = vld [vmem:[#allocation17_spill] sm:$0xff]  ;;  %v3556_v7 = vld [vmem:[#allocation26_spill] sm:$0xff] }
 0x3c1   :  { %1195 = vmatprep.subr.bf16.mxu0 %v2785_v10  ;;  %1236 = vmatprep.subr.bf16.mxu1 %v2766_v3  ;;  %v3552_v3 = vld [vmem:[#allocation22_spill] sm:$0xff]  ;;  %v3559_v10 = vld [vmem:[#allocation23_spill] sm:$0xff] }
 0x3c2   :  { %1225 = vmatprep.mubr.bf16.mxu0 %v3529_v37  ;;  %1266 = vmatprep.mubr.bf16.mxu1 %v3529_v37 }
 0x3c4   :  { %1196 = vmatpush1.bf16.msra.mxu0 %v2788_v11  ;;  %1237 = vmatpush1.bf16.msra.mxu1 %v2769_v4  ;;  %v3553_v4 = vld [vmem:[#allocation18_spill] sm:$0xff]  ;;  %v3560_v11 = vld [vmem:[#allocation24_spill] sm:$0xff] }
 0x3c5   :  { %1197 = vmatprep.subr.bf16.mxu0 %v2794_v13  ;;  %1238 = vmatprep.subr.bf16.mxu1 %v2772_v5  ;;  %v3554_v5 = vld [vmem:[#allocation25_spill] sm:$0xff] }
 0x3c8   :  { %1198 = vmatpush1.bf16.msra.mxu0 %v2800_v15  ;;  %1239 = vmatpush1.bf16.msra.mxu1 %v2779_v8  ;;  %v3557_v8 = vld [vmem:[#allocation20_spill] sm:$0xff] }
 0x3c9   :  { %1199 = vmatprep.subr.bf16.mxu0 %v2803_v16  ;;  %1240 = vmatprep.subr.bf16.mxu1 %v2781_v9  ;;  %v3558_v9 = vld [vmem:[#allocation27_spill] sm:$0xff] }
 0x3cc   :  { %1200 = vmatpush1.bf16.msra.mxu0 %v2812_v19  ;;  %1241 = vmatpush1.bf16.msra.mxu1 %v2792_v12  ;;  %v3561_v12 = vld [vmem:[#allocation28_spill] sm:$0xff] }
 0x3cd   :  { %1201 = vmatprep.subr.bf16.mxu0 %v2815_v20  ;;  %1242 = vmatprep.subr.bf16.mxu1 %v2797_v14 }
 0x3d0   :  { %1202 = vmatpush1.bf16.msra.mxu0 %v2824_v23  ;;  %1243 = vmatpush1.bf16.msra.mxu1 %v2806_v17 }
 0x3d1   :  { %1203 = vmatprep.subr.bf16.mxu0 %v2827_v24  ;;  %1244 = vmatprep.subr.bf16.mxu1 %v2809_v18 }
 0x3d4   :  { %1204 = vmatpush1.bf16.msra.mxu0 %v3550_v1  ;;  %1245 = vmatpush1.bf16.msra.mxu1 %v3551_v2 }
 0x3d5   :  { %1205 = vmatprep.subr.bf16.mxu0 %v3552_v3  ;;  %1246 = vmatprep.subr.bf16.mxu1 %v3553_v4 }
 0x3d8   :  { %1206 = vmatpush1.bf16.msra.mxu0 %v3554_v5  ;;  %1247 = vmatpush1.bf16.msra.mxu1 %v3555_v6 }
 0x3d9   :  { %1207 = vmatprep.subr.bf16.mxu0 %v3556_v7  ;;  %1248 = vmatprep.subr.bf16.mxu1 %v3557_v8 }
 0x3dc   :  { %1208 = vmatpush1.bf16.msra.mxu0 %v3558_v9  ;;  %1249 = vmatpush1.bf16.msra.mxu1 %v3559_v10 }
 0x3dd   :  { %1278 = vmatprep.subr.bf16.mxu0 %v3560_v11  ;;  %1319 = vmatprep.subr.bf16.mxu1 %v3561_v12 }
 0x482   :  { %v1029_v13 = vpop.f32.mrb[20].mxu0  ;;  %v1070_v14 = vpop.f32.mrb[28].mxu1 }
 0x483   :  { %v1031_v15 = vpop.f32.mrb[21].mxu0  ;;  %v1072_v16 = vpop.f32.mrb[29].mxu1 }
 0x484   :  { %v1033_v17 = vpop.f32.mrb[22].mxu0  ;;  %v1074_v18 = vpop.f32.mrb[30].mxu1 }
 0x485   :  { %v1034_v19 = vpop.f32.mrb[23].mxu0  ;;  %v1075_v20 = vpop.f32.mrb[31].mxu1  ;;  %v3223_v17 = vld [vmem:[#allocation9 + $0x80] ss:$16 sps:$4 sm:$0xff]   ;;  %v3226_v18 = vld [vmem:[#allocation9 + $0x88] ss:$16 sps:$4 sm:$0xff]  }
 0x486   :  { %v3229_v19 = vld [vmem:[#allocation9 + $0xa4] ss:$16 sps:$4 sm:$0xff]   ;;  %v3232_v20 = vld [vmem:[#allocation9 + $0xac] ss:$16 sps:$4 sm:$0xff]  }
 0x492   :  { %v1114_v23 = vpop.f32.mrb[24].mxu0  ;;  %v1155_v24 = vpop.f32.mrb[32].mxu1 }
 0x493   :  { %v1115_v52 = vadd.f32 %v1114_v23, %v1029_v13  ;;  %v1156_v25 = vadd.f32 %v1155_v24, %v1070_v14  ;;  %v1116_v35 = vpop.f32.mrb[25].mxu0  ;;  %v1157_v51 = vpop.f32.mrb[33].mxu1  ;;  %v3211_v13 = vld [vmem:[#allocation9 + $0x60] ss:$16 sps:$4 sm:$0xff]   ;;  %v3214_v14 = vld [vmem:[#allocation9 + $0x68] ss:$16 sps:$4 sm:$0xff]  }
 0x494   :  { %v1117_v42 = vadd.f32 %v1116_v35, %v1031_v15  ;;  %v1158_v26 = vadd.f32 %v1157_v51, %v1072_v16  ;;  %v1118_v57 = vpop.f32.mrb[26].mxu0  ;;  %v1159_v62 = vpop.f32.mrb[34].mxu1  ;;  %v3217_v15 = vld [vmem:[#allocation9 + $0x84] ss:$16 sps:$4 sm:$0xff]   ;;  %v3220_v16 = vld [vmem:[#allocation9 + $0x8c] ss:$16 sps:$4 sm:$0xff]  }
 0x495   :  { %v1162_v56 = vadd.f32 %v1115_v52, %v3537_v22  ;;  %v1119_v43 = vpop.f32.mrb[27].mxu0  ;;  %v1160_v59 = vpop.f32.mrb[35].mxu1  ;;  %v1164_v53 = vadd.f32 %v1156_v25, %v2954_v61  ;;  %v3235_v23 = vld [vmem:[#allocation9 + $0xa0] ss:$16 sps:$4 sm:$0xff]   ;;  %v3238_v24 = vld [vmem:[#allocation9 + $0xa8] ss:$16 sps:$4 sm:$0xff]  }
 0x496   :  { %v1163_v60 = vadd.f32 %v1117_v42, %v2950_v0  ;;  %v1165_v21 = vadd.f32 %v1158_v26, %v2956_v63  ;;  %3562 = vst [vmem:[#allocation29_spill] sm:$0xff] %v3235_v23  ;;  %3563 = vst [vmem:[#allocation21_spill] sm:$0xff] %v3238_v24  ;;  %v3241_v52 = vld [vmem:[#allocation9 + $0xc4] ss:$16 sps:$4 sm:$0xff]   ;;  %v3244_v25 = vld [vmem:[#allocation9 + $0xcc] ss:$16 sps:$4 sm:$0xff]  }
 0x497   :  { %v2192_v58 = vmul.f32 -1.442695, %v1162_v56  ;;  %v2194_v28 = vmul.f32 -1.442695, %v1164_v53  ;;  %3564 = vst [vmem:[#allocation17_spill] sm:$0xff] %v3241_v52  ;;  %3565 = vst [vmem:[#allocation22_spill] sm:$0xff] %v3244_v25 }
 0x498   :  { %v2193_v31 = vmul.f32 -1.442695, %v1163_v60  ;;  %v3247_v35 = vld [vmem:[#allocation9 + $0xc0] ss:$16 sps:$4 sm:$0xff]   ;;  %v3250_v51 = vld [vmem:[#allocation9 + $0xc8] ss:$16 sps:$4 sm:$0xff]  }
 0x499   :  { %2394 = vpow2.f32 %v2192_v58  ;;  %3566 = vst [vmem:[#allocation18_spill] sm:$0xff] %v3247_v35  ;;  %3567 = vst [vmem:[#allocation25_spill] sm:$0xff] %v3250_v51  ;;  %v3253_v42 = vld [vmem:[#allocation9 + $0xe4] ss:$16 sps:$4 sm:$0xff]   ;;  %v3256_v26 = vld [vmem:[#allocation9 + $0xec] ss:$16 sps:$4 sm:$0xff]  }
 0x49a   :  { %2396 = vpow2.f32 %v2193_v31  ;;  %3568 = vst [vmem:[#allocation19_spill] sm:$0xff] %v3253_v42  ;;  %3569 = vst [vmem:[#allocation26_spill] sm:$0xff] %v3256_v26  ;;  %v3259_v57 = vld [vmem:[#allocation9 + $0xe0] ss:$16 sps:$4 sm:$0xff]   ;;  %v3262_v62 = vld [vmem:[#allocation9 + $0xe8] ss:$16 sps:$4 sm:$0xff]  }
 0x49b   :  { %2398 = vtanh.f32 %v1165_v21  ;;  %3570 = vst [vmem:[#allocation20_spill] sm:$0xff] %v3259_v57  ;;  %3571 = vst [vmem:[#allocation27_spill] sm:$0xff] %v3262_v62  ;;  %v3265_v56 = vld [vmem:[#allocation7 + $0x4] ss:$16 sps:$4 sm:$0xff]  }
 0x49c   :  { %2400 = vpow2.f32 %v2194_v28  ;;  %3572 = vst [vmem:[#allocation23_spill] sm:$0xff] %v3265_v56 }
 0x4a3   :  { %v2395_v54 = vpop.eup %2394 }
 0x4a4   :  { %v1175_v27 = vadd.f32 1.0, %v2395_v54  ;;  %v2397_v33 = vpop.eup %2396 }
 0x4a5   :  { %v1176_v30 = vadd.f32 1.0, %v2397_v33  ;;  %v2399_v29 = vpop.eup %2398 }
 0x4a6   :  { %2402 = vrcp.f32 %v1175_v27  ;;  %v2401_v1 = vpop.eup %2400 }
 0x4a7   :  { %2404 = vrcp.f32 %v1176_v30  ;;  %v1177_v5 = vadd.f32 1.0, %v2401_v1 }
 0x4a9   :  { %2406 = vrcp.f32 %v1177_v5 }
 0x4b0   :  { %v2403_v2 = vpop.eup %2402 }
 0x4b1   :  { %v1186_v3 = vmul.f32 %v2403_v2, %v2399_v29  ;;  %v2405_v4 = vpop.eup %2404 }
 0x4b2   :  { %v1185_v6 = vmul.f32 %v2405_v4, %v3084_v55  ;;  %v3208_v55 = vld [vmem:[#allocation9 + $0x6c] ss:$16 sps:$4 sm:$0xff]  }
 0x4b3   :  { %v2407_v8 = vpop.eup %2406 }
 0x4b4   :  { %v3146_v7 = vadd.f32 %v1186_v3, %v1185_v6 }
 0x4b6   :  { %2408 = vtanh.f32 %v3146_v7 }
 0x4c0   :  { %v2409_v9 = vpop.eup %2408 }
 0x4c1   :  { %v1189_v10 = vmul.f32 %v2409_v9, %v2407_v8 }
 0x4c3   :  { %v1192_v11 = vpack.c.bf16 %v1189_v10, %v1189_v10 }
 0x4c5   :  { %1226 = vmatmul.mubr.bf16.vlgmr.msra.gmra.mrb[28].mxu0 %v1192_v11  ;;  %1267 = vmatmul.mubr.bf16.vlgmr.msra.gmra.mrb[36].mxu1 %v1192_v11 }
 0x4c6   :  { %1279 = vmatpush1.bf16.msra.mxu0 %v2850_v32  ;;  %1320 = vmatpush1.bf16.msra.mxu1 %v2890_v44  ;;  %v1191_v32 = vld [vmem:[#allocation4 + $0x10] sm:$0xf] }
 0x4c7   :  { %1280 = vmatprep.subr.bf16.mxu0 %v2856_v34  ;;  %1321 = vmatprep.subr.bf16.mxu1 %v2893_v45  ;;  %v3165_v34 = vld [vmem:[#allocation9 + $0x4] ss:$16 sps:$4 sm:$0xff]   ;;  %v3187_v44 = vld [vmem:[#allocation9 + $0x20] ss:$16 sps:$4 sm:$0xff]   ;;  %v3190_v45 = vld [vmem:[#allocation9 + $0x28] ss:$16 sps:$4 sm:$0xff]  }
 0x4c8   :  { %1310 = vmatprep.mubr.bf16.mxu0 %v3529_v37  ;;  %1351 = vmatprep.mubr.bf16.mxu1 %v3529_v37 }
 0x4ca   :  { %1281 = vmatpush1.bf16.msra.mxu0 %v2861_v36  ;;  %1322 = vmatpush1.bf16.msra.mxu1 %v2899_v46  ;;  %v3168_v36 = vld [vmem:[#allocation9 + $0xc] ss:$16 sps:$4 sm:$0xff]   ;;  %v3193_v46 = vld [vmem:[#allocation9 + $0x44] ss:$16 sps:$4 sm:$0xff]  }
 0x4cb   :  { %1282 = vmatprep.subr.bf16.mxu0 %v2864_v38  ;;  %1323 = vmatprep.subr.bf16.mxu1 %v2903_v47  ;;  %v3173_v38 = vld [vmem:[#allocation9] ss:$16 sps:$4 sm:$0xff]   ;;  %v3196_v47 = vld [vmem:[#allocation9 + $0x4c] ss:$16 sps:$4 sm:$0xff]  }
 0x4ce   :  { %1283 = vmatpush1.bf16.msra.mxu0 %v2873_v39  ;;  %1324 = vmatpush1.bf16.msra.mxu1 %v2908_v48  ;;  %v3176_v39 = vld [vmem:[#allocation9 + $0x8] ss:$16 sps:$4 sm:$0xff]   ;;  %v3199_v48 = vld [vmem:[#allocation9 + $0x40] ss:$16 sps:$4 sm:$0xff]  }
 0x4cf   :  { %1284 = vmatprep.subr.bf16.mxu0 %v2876_v40  ;;  %1325 = vmatprep.subr.bf16.mxu1 %v2911_v49  ;;  %v3179_v40 = vld [vmem:[#allocation9 + $0x24] ss:$16 sps:$4 sm:$0xff]   ;;  %v3202_v49 = vld [vmem:[#allocation9 + $0x48] ss:$16 sps:$4 sm:$0xff]  }
 0x4d2   :  { %1285 = vmatpush1.bf16.msra.mxu0 %v2882_v41  ;;  %1326 = vmatpush1.bf16.msra.mxu1 %v2916_v50  ;;  %v3182_v41 = vld [vmem:[#allocation9 + $0x2c] ss:$16 sps:$4 sm:$0xff]   ;;  %v3205_v50 = vld [vmem:[#allocation9 + $0x64] ss:$16 sps:$4 sm:$0xff]  }
 0x4d3   :  { %1391 = vmatprep.subr.bf16.mxu0 %v3165_v34  ;;  %1432 = vmatprep.subr.bf16.mxu1 %v3168_v36 }
 0x4d5   :  { %2195 = vmatmul.mubr.msk.bf16.vlgmr.msra.gmra.mrb[32].mxu0 %vm482_vm0, %v1191_v32  ;;  %2196 = vmatmul.mubr.msk.bf16.vlgmr.msra.gmra.mrb[40].mxu1 %vm482_vm0, %v1191_v32 }
 0x4d6   :  { %1392 = vmatpush1.bf16.msra.mxu0 %v3173_v38  ;;  %1433 = vmatpush1.bf16.msra.mxu1 %v3176_v39 }
 0x4d7   :  { %1393 = vmatprep.subr.bf16.mxu0 %v3179_v40  ;;  %1434 = vmatprep.subr.bf16.mxu1 %v3182_v41 }
 0x4d8   :  { %1423 = vmatprep.mubr.bf16.mxu0 %v3529_v37  ;;  %1464 = vmatprep.mubr.bf16.mxu1 %v3529_v37 }
 0x4da   :  { %1394 = vmatpush1.bf16.msra.mxu0 %v3187_v44  ;;  %1435 = vmatpush1.bf16.msra.mxu1 %v3190_v45 }
 0x4db   :  { %1395 = vmatprep.subr.bf16.mxu0 %v3193_v46  ;;  %1436 = vmatprep.subr.bf16.mxu1 %v3196_v47 }
 0x4de   :  { %1396 = vmatpush1.bf16.msra.mxu0 %v3199_v48  ;;  %1437 = vmatpush1.bf16.msra.mxu1 %v3202_v49 }
 0x4df   :  { %1397 = vmatprep.subr.bf16.mxu0 %v3205_v50  ;;  %1438 = vmatprep.subr.bf16.mxu1 %v3208_v55 }
 0x4e2   :  { %1398 = vmatpush1.bf16.msra.mxu0 %v3211_v13  ;;  %1439 = vmatpush1.bf16.msra.mxu1 %v3214_v14 }
 0x4e3   :  { %1399 = vmatprep.subr.bf16.mxu0 %v3217_v15  ;;  %1440 = vmatprep.subr.bf16.mxu1 %v3220_v16 }
 0x4e6   :  { %1400 = vmatpush1.bf16.msra.mxu0 %v3223_v17  ;;  %1441 = vmatpush1.bf16.msra.mxu1 %v3226_v18 }
 0x4e7   :  { %1401 = vmatprep.subr.bf16.mxu0 %v3229_v19  ;;  %1442 = vmatprep.subr.bf16.mxu1 %v3232_v20 }
 0x4ea   :  { %1402 = vmatpush1.bf16.msra.mxu0 %v3235_v23  ;;  %1443 = vmatpush1.bf16.msra.mxu1 %v3238_v24 }
 0x4eb   :  { %1403 = vmatprep.subr.bf16.mxu0 %v3241_v52  ;;  %1444 = vmatprep.subr.bf16.mxu1 %v3244_v25 }
 0x4ee   :  { %1404 = vmatpush1.bf16.msra.mxu0 %v3247_v35  ;;  %1445 = vmatpush1.bf16.msra.mxu1 %v3250_v51 }
 0x4ef   :  { %1405 = vmatprep.subr.bf16.mxu0 %v3253_v42  ;;  %1446 = vmatprep.subr.bf16.mxu1 %v3256_v26 }
 0x4f2   :  { %1406 = vmatpush1.bf16.msra.mxu0 %v3259_v57  ;;  %1447 = vmatpush1.bf16.msra.mxu1 %v3262_v62 }
 0x4f3   :  { %1476 = vmatprep.subr.bf16.mxu0 %v3265_v56  ;;  %1517 = vmatprep.subr.bf16.mxu1 %v3561_v12 }
 0x598   :  { %v1227_v43 = vpop.f32.mrb[28].mxu0  ;;  %v1268_v59 = vpop.f32.mrb[36].mxu1 }
 0x599   :  { %v1229_v60 = vpop.f32.mrb[29].mxu0  ;;  %v1270_v58 = vpop.f32.mrb[37].mxu1 }
 0x59a   :  { %v1231_v31 = vpop.f32.mrb[30].mxu0  ;;  %v1272_v53 = vpop.f32.mrb[38].mxu1 }
 0x59b   :  { %v1232_v21 = vpop.f32.mrb[31].mxu0  ;;  %v1273_v28 = vpop.f32.mrb[39].mxu1 }
 0x5a8   :  { %v1312_v54 = vpop.f32.mrb[32].mxu0  ;;  %v1353_v27 = vpop.f32.mrb[40].mxu1 }
 0x5a9   :  { %v1313_v33 = vadd.f32 %v1312_v54, %v1227_v43  ;;  %v1354_v30 = vadd.f32 %v1353_v27, %v1268_v59  ;;  %v1314_v29 = vpop.f32.mrb[33].mxu0  ;;  %v1355_v1 = vpop.f32.mrb[41].mxu1 }
 0x5aa   :  { %v1315_v2 = vadd.f32 %v1314_v29, %v1229_v60  ;;  %v1356_v3 = vadd.f32 %v1355_v1, %v1270_v58  ;;  %v1316_v4 = vpop.f32.mrb[34].mxu0  ;;  %v1357_v5 = vpop.f32.mrb[42].mxu1 }
 0x5ab   :  { %v1360_v12 = vadd.f32 %v1313_v33, %v3537_v22  ;;  %v1317_v6 = vpop.f32.mrb[35].mxu0  ;;  %v1358_v8 = vpop.f32.mrb[43].mxu1  ;;  %v1362_v32 = vadd.f32 %v1354_v30, %v2954_v61 }
 0x5ac   :  { %v1361_v9 = vadd.f32 %v1315_v2, %v2950_v0  ;;  %v1363_v43 = vadd.f32 %v1356_v3, %v2956_v63  ;;  %v3280_v6 = vld [vmem:[#allocation7 + $0x8] ss:$16 sps:$4 sm:$0xff]   ;;  %v3286_v8 = vld [vmem:[#allocation7 + $0x2c] ss:$16 sps:$4 sm:$0xff]  }
 0x5ad   :  { %v2197_v10 = vmul.f32 -1.442695, %v1360_v12  ;;  %v2199_v59 = vmul.f32 -1.442695, %v1362_v32  ;;  %v3277_v12 = vld [vmem:[#allocation7] ss:$16 sps:$4 sm:$0xff]  }
 0x5ae   :  { %v2198_v11 = vmul.f32 -1.442695, %v1361_v9  ;;  %v3291_v9 = vld [vmem:[#allocation7 + $0x20] ss:$16 sps:$4 sm:$0xff]   ;;  %v3300_v32 = vld [vmem:[#allocation7 + $0x4c] ss:$16 sps:$4 sm:$0xff]  }
 0x5af   :  { %2410 = vpow2.f32 %v2197_v10  ;;  %v3294_v10 = vld [vmem:[#allocation7 + $0x28] ss:$16 sps:$4 sm:$0xff]  }
 0x5b0   :  { %2412 = vpow2.f32 %v2198_v11  ;;  %v3297_v11 = vld [vmem:[#allocation7 + $0x44] ss:$16 sps:$4 sm:$0xff]  }
 0x5b1   :  { %2414 = vtanh.f32 %v1363_v43  ;;  %v3303_v43 = vld [vmem:[#allocation7 + $0x40] ss:$16 sps:$4 sm:$0xff]  }
 0x5b2   :  { %2416 = vpow2.f32 %v2199_v59  ;;  %v3306_v59 = vld [vmem:[#allocation7 + $0x48] ss:$16 sps:$4 sm:$0xff]  }
 0x5b9   :  { %v2411_v31 = vpop.eup %2410 }
 0x5ba   :  { %v1373_v60 = vadd.f32 1.0, %v2411_v31  ;;  %v2413_v58 = vpop.eup %2412  ;;  %v3309_v31 = vld [vmem:[#allocation7 + $0x64] ss:$16 sps:$4 sm:$0xff]  }
 0x5bb   :  { %v1374_v53 = vadd.f32 1.0, %v2413_v58  ;;  %v2415_v21 = vpop.eup %2414  ;;  %v3315_v58 = vld [vmem:[#allocation7 + $0x60] ss:$16 sps:$4 sm:$0xff]  }
 0x5bc   :  { %2418 = vrcp.f32 %v1373_v60  ;;  %v2417_v28 = vpop.eup %2416  ;;  %v3312_v60 = vld [vmem:[#allocation7 + $0x6c] ss:$16 sps:$4 sm:$0xff]  }
 0x5bd   :  { %2420 = vrcp.f32 %v1374_v53  ;;  %v1375_v29 = vadd.f32 1.0, %v2417_v28  ;;  %v3318_v53 = vld [vmem:[#allocation7 + $0x68] ss:$16 sps:$4 sm:$0xff]   ;;  %v3358_v28 = vld [vmem:[#allocation7 + $0xc] ss:$16 sps:$4 sm:$0xff]  }
 0x5be   :  { %3573 = vst [vmem:[#allocation24_spill] sm:$0xff] %v3358_v28 }
 0x5bf   :  { %2422 = vrcp.f32 %v1375_v29 }
 0x5c6   :  { %v2419_v54 = vpop.eup %2418 }
 0x5c7   :  { %v1384_v27 = vmul.f32 %v2419_v54, %v2415_v21  ;;  %v2421_v33 = vpop.eup %2420  ;;  %v1389_v21 = vld [vmem:[#allocation4 + $0x14] sm:$0xf] }
 0x5c8   :  { %v1383_v1 = vmul.f32 %v2421_v33, %v3146_v7  ;;  %v3283_v7 = vld [vmem:[#allocation7 + $0x24] ss:$16 sps:$4 sm:$0xff]  }
 0x5c9   :  { %v2423_v2 = vpop.eup %2422 }
 0x5ca   :  { %v3274_v30 = vadd.f32 %v1384_v27, %v1383_v1 }
 0x5cc   :  { %2424 = vtanh.f32 %v3274_v30 }
 0x5d6   :  { %v2425_v3 = vpop.eup %2424 }
 0x5d7   :  { %v1387_v4 = vmul.f32 %v2425_v3, %v2423_v2 }
 0x5d9   :  { %v1390_v5 = vpack.c.bf16 %v1387_v4, %v1387_v4 }
 0x5db   :  { %1424 = vmatmul.mubr.bf16.vlgmr.msra.gmra.mrb[36].mxu0 %v1390_v5  ;;  %1465 = vmatmul.mubr.bf16.vlgmr.msra.gmra.mrb[44].mxu1 %v1390_v5 }
 0x5dc   :  { %1477 = vmatpush1.bf16.msra.mxu0 %v3277_v12  ;;  %1518 = vmatpush1.bf16.msra.mxu1 %v3280_v6 }
 0x5dd   :  { %1478 = vmatprep.subr.bf16.mxu0 %v3283_v7  ;;  %1519 = vmatprep.subr.bf16.mxu1 %v3286_v8 }
 0x5de   :  { %1508 = vmatprep.mubr.bf16.mxu0 %v3529_v37  ;;  %1549 = vmatprep.mubr.bf16.mxu1 %v3529_v37 }
 0x5e0   :  { %1479 = vmatpush1.bf16.msra.mxu0 %v3291_v9  ;;  %1520 = vmatpush1.bf16.msra.mxu1 %v3294_v10 }
 0x5e1   :  { %1480 = vmatprep.subr.bf16.mxu0 %v3297_v11  ;;  %1521 = vmatprep.subr.bf16.mxu1 %v3300_v32 }
 0x5e4   :  { %1481 = vmatpush1.bf16.msra.mxu0 %v3303_v43  ;;  %1522 = vmatpush1.bf16.msra.mxu1 %v3306_v59 }
 0x5e5   :  { %1482 = vmatprep.subr.bf16.mxu0 %v3309_v31  ;;  %1523 = vmatprep.subr.bf16.mxu1 %v3312_v60 }
 0x5e8   :  { %1483 = vmatpush1.bf16.msra.mxu0 %v3315_v58  ;;  %1524 = vmatpush1.bf16.msra.mxu1 %v3318_v53 }
 0x5e9   :  { %1589 = vmatprep.subr.bf16.mxu0 %v3165_v34  ;;  %1630 = vmatprep.subr.bf16.mxu1 %v3168_v36 }
 0x5eb   :  { %2200 = vmatmul.mubr.msk.bf16.vlgmr.msra.gmra.mrb[40].mxu0 %vm482_vm0, %v1389_v21  ;;  %2201 = vmatmul.mubr.msk.bf16.vlgmr.msra.gmra.mrb[48].mxu1 %vm482_vm0, %v1389_v21 }
 0x5ec   :  { %1590 = vmatpush1.bf16.msra.mxu0 %v3173_v38  ;;  %1631 = vmatpush1.bf16.msra.mxu1 %v3176_v39 }
 0x5ed   :  { %1591 = vmatprep.subr.bf16.mxu0 %v3179_v40  ;;  %1632 = vmatprep.subr.bf16.mxu1 %v3182_v41 }
 0x5ee   :  { %1621 = vmatprep.mubr.bf16.mxu0 %v3529_v37  ;;  %1662 = vmatprep.mubr.bf16.mxu1 %v3529_v37 }
 0x5f0   :  { %1592 = vmatpush1.bf16.msra.mxu0 %v3187_v44  ;;  %1633 = vmatpush1.bf16.msra.mxu1 %v3190_v45 }
 0x5f1   :  { %1593 = vmatprep.subr.bf16.mxu0 %v3193_v46  ;;  %1634 = vmatprep.subr.bf16.mxu1 %v3196_v47 }
 0x5f4   :  { %1594 = vmatpush1.bf16.msra.mxu0 %v3199_v48  ;;  %1635 = vmatpush1.bf16.msra.mxu1 %v3202_v49 }
 0x5f5   :  { %1595 = vmatprep.subr.bf16.mxu0 %v3205_v50  ;;  %1636 = vmatprep.subr.bf16.mxu1 %v3208_v55 }
 0x5f8   :  { %1596 = vmatpush1.bf16.msra.mxu0 %v3211_v13  ;;  %1637 = vmatpush1.bf16.msra.mxu1 %v3214_v14 }
 0x5f9   :  { %1597 = vmatprep.subr.bf16.mxu0 %v3217_v15  ;;  %1638 = vmatprep.subr.bf16.mxu1 %v3220_v16 }
 0x5fc   :  { %1598 = vmatpush1.bf16.msra.mxu0 %v3223_v17  ;;  %1639 = vmatpush1.bf16.msra.mxu1 %v3226_v18 }
 0x5fd   :  { %1599 = vmatprep.subr.bf16.mxu0 %v3229_v19  ;;  %1640 = vmatprep.subr.bf16.mxu1 %v3232_v20 }
 0x600   :  { %1600 = vmatpush1.bf16.msra.mxu0 %v3235_v23  ;;  %1641 = vmatpush1.bf16.msra.mxu1 %v3238_v24 }
 0x601   :  { %1601 = vmatprep.subr.bf16.mxu0 %v3241_v52  ;;  %1642 = vmatprep.subr.bf16.mxu1 %v3244_v25 }
 0x604   :  { %1602 = vmatpush1.bf16.msra.mxu0 %v3247_v35  ;;  %1643 = vmatpush1.bf16.msra.mxu1 %v3250_v51 }
 0x605   :  { %1603 = vmatprep.subr.bf16.mxu0 %v3253_v42  ;;  %1644 = vmatprep.subr.bf16.mxu1 %v3256_v26 }
 0x608   :  { %1604 = vmatpush1.bf16.msra.mxu0 %v3259_v57  ;;  %1645 = vmatpush1.bf16.msra.mxu1 %v3262_v62 }
 0x609   :  { %1674 = vmatprep.subr.bf16.mxu0 %v3265_v56  ;;  %1715 = vmatprep.subr.bf16.mxu1 %v3358_v28 }
 0x6ae   :  { %v1425_v54 = vpop.f32.mrb[36].mxu0  ;;  %v1466_v27 = vpop.f32.mrb[44].mxu1 }
 0x6af   :  { %v1427_v33 = vpop.f32.mrb[37].mxu0  ;;  %v1468_v29 = vpop.f32.mrb[45].mxu1 }
 0x6b0   :  { %v1429_v1 = vpop.f32.mrb[38].mxu0  ;;  %v1470_v2 = vpop.f32.mrb[46].mxu1 }
 0x6b1   :  { %v1430_v3 = vpop.f32.mrb[39].mxu0  ;;  %v1471_v4 = vpop.f32.mrb[47].mxu1 }
 0x6be   :  { %v1510_v5 = vpop.f32.mrb[40].mxu0  ;;  %v1551_v21 = vpop.f32.mrb[48].mxu1 }
 0x6bf   :  { %v1511_v26 = vadd.f32 %v1510_v5, %v1425_v54  ;;  %v1552_v57 = vadd.f32 %v1551_v21, %v1466_v27  ;;  %v1512_v42 = vpop.f32.mrb[41].mxu0  ;;  %v1553_v62 = vpop.f32.mrb[49].mxu1 }
 0x6c0   :  { %v1513_v51 = vadd.f32 %v1512_v42, %v1427_v33  ;;  %v1554_v56 = vadd.f32 %v1553_v62, %v1468_v29  ;;  %v1514_v35 = vpop.f32.mrb[42].mxu0  ;;  %v1555_v25 = vpop.f32.mrb[50].mxu1 }
 0x6c1   :  { %v1558_v28 = vadd.f32 %v1511_v26, %v3537_v22  ;;  %v1515_v52 = vpop.f32.mrb[43].mxu0  ;;  %v1556_v24 = vpop.f32.mrb[51].mxu1  ;;  %v1560_v3 = vadd.f32 %v1552_v57, %v2954_v61 }
 0x6c2   :  { %v1559_v23 = vadd.f32 %v1513_v51, %v2950_v0  ;;  %v1561_v54 = vadd.f32 %v1554_v56, %v2956_v63 }
 0x6c3   :  { %v2202_v1 = vmul.f32 -1.442695, %v1558_v28  ;;  %v2204_v27 = vmul.f32 -1.442695, %v1560_v3 }
 0x6c4   :  { %v2203_v2 = vmul.f32 -1.442695, %v1559_v23 }
 0x6c5   :  { %2426 = vpow2.f32 %v2202_v1 }
 0x6c6   :  { %2428 = vpow2.f32 %v2203_v2 }
 0x6c7   :  { %2430 = vtanh.f32 %v1561_v54 }
 0x6c8   :  { %2432 = vpow2.f32 %v2204_v27 }
 0x6cf   :  { %v2427_v4 = vpop.eup %2426 }
 0x6d0   :  { %v1571_v42 = vadd.f32 1.0, %v2427_v4  ;;  %v2429_v35 = vpop.eup %2428 }
 0x6d1   :  { %v1572_v25 = vadd.f32 1.0, %v2429_v35  ;;  %v2431_v24 = vpop.eup %2430 }
 0x6d2   :  { %2434 = vrcp.f32 %v1571_v42  ;;  %v2433_v52 = vpop.eup %2432 }
 0x6d3   :  { %2436 = vrcp.f32 %v1572_v25  ;;  %v1573_v62 = vadd.f32 1.0, %v2433_v52 }
 0x6d5   :  { %2438 = vrcp.f32 %v1573_v62 }
 0x6dc   :  { %v2435_v51 = vpop.eup %2434 }
 0x6dd   :  { %v1582_v26 = vmul.f32 %v2435_v51, %v2431_v24  ;;  %v2437_v23 = vpop.eup %2436 }
 0x6de   :  { %v1581_v28 = vmul.f32 %v2437_v23, %v3274_v30  ;;  %v1587_v30 = vld [vmem:[#allocation4 + $0x18] sm:$0xf] }
 0x6df   :  { %v2439_v56 = vpop.eup %2438 }
 0x6e0   :  { %v3366_v57 = vadd.f32 %v1582_v26, %v1581_v28 }
 0x6e2   :  { %2440 = vtanh.f32 %v3366_v57 }
 0x6ec   :  { %v2441_v33 = vpop.eup %2440 }
 0x6ed   :  { %v1585_v29 = vmul.f32 %v2441_v33, %v2439_v56 }
 0x6ef   :  { %v1588_v5 = vpack.c.bf16 %v1585_v29, %v1585_v29 }
 0x6f1   :  { %1622 = vmatmul.mubr.bf16.vlgmr.msra.gmra.mrb[44].mxu0 %v1588_v5  ;;  %1663 = vmatmul.mubr.bf16.vlgmr.msra.gmra.mrb[52].mxu1 %v1588_v5 }
 0x6f2   :  { %1675 = vmatpush1.bf16.msra.mxu0 %v3277_v12  ;;  %1716 = vmatpush1.bf16.msra.mxu1 %v3280_v6 }
 0x6f3   :  { %1676 = vmatprep.subr.bf16.mxu0 %v3283_v7  ;;  %1717 = vmatprep.subr.bf16.mxu1 %v3286_v8 }
 0x6f4   :  { %1706 = vmatprep.mubr.bf16.mxu0 %v3529_v37  ;;  %1747 = vmatprep.mubr.bf16.mxu1 %v3529_v37 }
 0x6f6   :  { %1677 = vmatpush1.bf16.msra.mxu0 %v3291_v9  ;;  %1718 = vmatpush1.bf16.msra.mxu1 %v3294_v10 }
 0x6f7   :  { %1678 = vmatprep.subr.bf16.mxu0 %v3297_v11  ;;  %1719 = vmatprep.subr.bf16.mxu1 %v3300_v32 }
 0x6fa   :  { %1679 = vmatpush1.bf16.msra.mxu0 %v3303_v43  ;;  %1720 = vmatpush1.bf16.msra.mxu1 %v3306_v59 }
 0x6fb   :  { %1680 = vmatprep.subr.bf16.mxu0 %v3309_v31  ;;  %1721 = vmatprep.subr.bf16.mxu1 %v3312_v60 }
 0x6fe   :  { %1681 = vmatpush1.bf16.msra.mxu0 %v3315_v58  ;;  %1722 = vmatpush1.bf16.msra.mxu1 %v3318_v53 }
 0x6ff   :  { %1787 = vmatprep.subr.bf16.mxu0 %v3165_v34  ;;  %1828 = vmatprep.subr.bf16.mxu1 %v3168_v36  ;;  %v3574_v34 = vld [vmem:[#allocation29_spill] sm:$0xff] }
 0x700   :  { %v3575_v36 = vld [vmem:[#allocation21_spill] sm:$0xff] }
 0x701   :  { %2205 = vmatmul.mubr.msk.bf16.vlgmr.msra.gmra.mrb[48].mxu0 %vm482_vm0, %v1587_v30  ;;  %2206 = vmatmul.mubr.msk.bf16.vlgmr.msra.gmra.mrb[56].mxu1 %vm482_vm0, %v1587_v30 }
 0x702   :  { %1788 = vmatpush1.bf16.msra.mxu0 %v3173_v38  ;;  %1829 = vmatpush1.bf16.msra.mxu1 %v3176_v39  ;;  %v3576_v38 = vld [vmem:[#allocation17_spill] sm:$0xff]  ;;  %v3577_v39 = vld [vmem:[#allocation22_spill] sm:$0xff] }
 0x703   :  { %1789 = vmatprep.subr.bf16.mxu0 %v3179_v40  ;;  %1830 = vmatprep.subr.bf16.mxu1 %v3182_v41  ;;  %v3578_v40 = vld [vmem:[#allocation18_spill] sm:$0xff]  ;;  %v3579_v41 = vld [vmem:[#allocation25_spill] sm:$0xff] }
 0x704   :  { %1819 = vmatprep.mubr.bf16.mxu0 %v3529_v37  ;;  %1860 = vmatprep.mubr.bf16.mxu1 %v3529_v37 }
 0x706   :  { %1790 = vmatpush1.bf16.msra.mxu0 %v3187_v44  ;;  %1831 = vmatpush1.bf16.msra.mxu1 %v3190_v45  ;;  %v3580_v44 = vld [vmem:[#allocation19_spill] sm:$0xff]  ;;  %v3581_v45 = vld [vmem:[#allocation26_spill] sm:$0xff] }
 0x707   :  { %1791 = vmatprep.subr.bf16.mxu0 %v3193_v46  ;;  %1832 = vmatprep.subr.bf16.mxu1 %v3196_v47  ;;  %v3582_v46 = vld [vmem:[#allocation20_spill] sm:$0xff]  ;;  %v3583_v47 = vld [vmem:[#allocation27_spill] sm:$0xff] }
 0x70a   :  { %1792 = vmatpush1.bf16.msra.mxu0 %v3199_v48  ;;  %1833 = vmatpush1.bf16.msra.mxu1 %v3202_v49  ;;  %v3584_v48 = vld [vmem:[#allocation23_spill] sm:$0xff]  ;;  %v3585_v49 = vld [vmem:[#allocation24_spill] sm:$0xff] }
 0x70b   :  { %1793 = vmatprep.subr.bf16.mxu0 %v3205_v50  ;;  %1834 = vmatprep.subr.bf16.mxu1 %v3208_v55 }
 0x70e   :  { %1794 = vmatpush1.bf16.msra.mxu0 %v3211_v13  ;;  %1835 = vmatpush1.bf16.msra.mxu1 %v3214_v14 }
 0x70f   :  { %1795 = vmatprep.subr.bf16.mxu0 %v3217_v15  ;;  %1836 = vmatprep.subr.bf16.mxu1 %v3220_v16 }
 0x712   :  { %1796 = vmatpush1.bf16.msra.mxu0 %v3223_v17  ;;  %1837 = vmatpush1.bf16.msra.mxu1 %v3226_v18 }
 0x713   :  { %1797 = vmatprep.subr.bf16.mxu0 %v3229_v19  ;;  %1838 = vmatprep.subr.bf16.mxu1 %v3232_v20 }
 0x716   :  { %1798 = vmatpush1.bf16.msra.mxu0 %v3574_v34  ;;  %1839 = vmatpush1.bf16.msra.mxu1 %v3575_v36 }
 0x717   :  { %1799 = vmatprep.subr.bf16.mxu0 %v3576_v38  ;;  %1840 = vmatprep.subr.bf16.mxu1 %v3577_v39 }
 0x71a   :  { %1800 = vmatpush1.bf16.msra.mxu0 %v3578_v40  ;;  %1841 = vmatpush1.bf16.msra.mxu1 %v3579_v41 }
 0x71b   :  { %1801 = vmatprep.subr.bf16.mxu0 %v3580_v44  ;;  %1842 = vmatprep.subr.bf16.mxu1 %v3581_v45 }
 0x71e   :  { %1802 = vmatpush1.bf16.msra.mxu0 %v3582_v46  ;;  %1843 = vmatpush1.bf16.msra.mxu1 %v3583_v47 }
 0x71f   :  { %1872 = vmatprep.subr.bf16.mxu0 %v3584_v48  ;;  %1913 = vmatprep.subr.bf16.mxu1 %v3585_v49 }
 0x7c4   :  { %v1623_v50 = vpop.f32.mrb[44].mxu0  ;;  %v1664_v55 = vpop.f32.mrb[52].mxu1 }
 0x7c5   :  { %v1625_v13 = vpop.f32.mrb[45].mxu0  ;;  %v1666_v14 = vpop.f32.mrb[53].mxu1 }
 0x7c6   :  { %v1627_v15 = vpop.f32.mrb[46].mxu0  ;;  %v1668_v16 = vpop.f32.mrb[54].mxu1 }
 0x7c7   :  { %v1628_v17 = vpop.f32.mrb[47].mxu0  ;;  %v1669_v18 = vpop.f32.mrb[55].mxu1 }
 0x7d4   :  { %v1708_v19 = vpop.f32.mrb[48].mxu0  ;;  %v1749_v20 = vpop.f32.mrb[56].mxu1 }
 0x7d5   :  { %v1709_v21 = vadd.f32 %v1708_v19, %v1623_v50  ;;  %v1750_v1 = vadd.f32 %v1749_v20, %v1664_v55  ;;  %v1710_v2 = vpop.f32.mrb[49].mxu0  ;;  %v1751_v3 = vpop.f32.mrb[57].mxu1 }
 0x7d6   :  { %v1711_v54 = vadd.f32 %v1710_v2, %v1625_v13  ;;  %v1752_v27 = vadd.f32 %v1751_v3, %v1666_v14  ;;  %v1712_v4 = vpop.f32.mrb[50].mxu0  ;;  %v1753_v42 = vpop.f32.mrb[58].mxu1 }
 0x7d7   :  { %v1756_v35 = vadd.f32 %v1709_v21, %v3537_v22  ;;  %v1713_v25 = vpop.f32.mrb[51].mxu0  ;;  %v1754_v24 = vpop.f32.mrb[59].mxu1  ;;  %v1758_v23 = vadd.f32 %v1750_v1, %v2954_v61 }
 0x7d8   :  { %v1757_v52 = vadd.f32 %v1711_v54, %v2950_v0  ;;  %v1759_v62 = vadd.f32 %v1752_v27, %v2956_v63 }
 0x7d9   :  { %v2207_v51 = vmul.f32 -1.442695, %v1756_v35  ;;  %v2209_v28 = vmul.f32 -1.442695, %v1758_v23 }
 0x7da   :  { %v2208_v26 = vmul.f32 -1.442695, %v1757_v52 }
 0x7db   :  { %2442 = vpow2.f32 %v2207_v51 }
 0x7dc   :  { %2444 = vpow2.f32 %v2208_v26 }
 0x7dd   :  { %2446 = vtanh.f32 %v1759_v62 }
 0x7de   :  { %2448 = vpow2.f32 %v2209_v28 }
 0x7e5   :  { %v2443_v56 = vpop.eup %2442 }
 0x7e6   :  { %v1769_v33 = vadd.f32 1.0, %v2443_v56  ;;  %v2445_v29 = vpop.eup %2444 }
 0x7e7   :  { %v1770_v5 = vadd.f32 1.0, %v2445_v29  ;;  %v2447_v30 = vpop.eup %2446 }
 0x7e8   :  { %2450 = vrcp.f32 %v1769_v33  ;;  %v2449_v34 = vpop.eup %2448 }
 0x7e9   :  { %2452 = vrcp.f32 %v1770_v5  ;;  %v1771_v40 = vadd.f32 1.0, %v2449_v34  ;;  %v2215_v34 = vld [vmem:[%s3474_s5] ss:$0 sm:$0xff]  ;;  %s2614_s5 = scalar_lea.vmem %s2117_s24, 128 }
 0x7ea   :  { %p2615_p4 = scmp.ne.s32.totalorder %s2117_s24, %s2614_s5  ;;  %p2620_p6 = scmp.lt.s32.totalorder %s2614_s5, %s2614_s5 }
 0x7eb   :  { %2454 = vrcp.f32 %v1771_v40 }
 0x7ec   :  { %p2621_p7 = por %p2620_p6, %p2619_p5 }
 0x7ee   :  { %p2622_p8 = pnand %p2621_p7, %p2615_p4 }
 0x7f2   :  { %v2451_v36 = vpop.eup %2450 }
 0x7f3   :  { %v1780_v38 = vmul.f32 %v2451_v36, %v2447_v30  ;;  %v2453_v39 = vpop.eup %2452 }
 0x7f4   :  { %v1779_v41 = vmul.f32 %v2453_v39, %v3366_v57 }
 0x7f5   :  { %v2455_v45 = vpop.eup %2454 }
 0x7f6   :  { %v3428_v44 = vadd.f32 %v1780_v38, %v1779_v41 }
 0x7f8   :  { %2456 = vtanh.f32 %v3428_v44 }
 0x802   :  { %v2457_v46 = vpop.eup %2456 }
 0x803   :  { %v1783_v47 = vmul.f32 %v2457_v46, %v2455_v45 }
 0x805   :  { %v1786_v48 = vpack.c.bf16 %v1783_v47, %v1783_v47 }
 0x807   :  { %1820 = vmatmul.mubr.bf16.vlgmr.msra.gmra.mrb[52].mxu0 %v1786_v48  ;;  %1861 = vmatmul.mubr.bf16.vlgmr.msra.gmra.mrb[60].mxu1 %v1786_v48 }
 0x808   :  { %1873 = vmatpush1.bf16.msra.mxu0 %v3277_v12  ;;  %1914 = vmatpush1.bf16.msra.mxu1 %v3280_v6  ;;  %v2338_v12 = vld [vmem:[#allocation10] sm:$0xff]   ;;  %v2654_v6 = vmov 0.0  }
 0x809   :  { %1874 = vmatprep.subr.bf16.mxu0 %v3283_v7  ;;  %1915 = vmatprep.subr.bf16.mxu1 %v3286_v8  ;;  %v2339_v7 = vld [vmem:[#allocation10 + $0x8] sm:$0xff]   ;;  %v2340_v8 = vld [vmem:[#allocation10 + $0x10] sm:$0xff]  }
 0x80a   :  { %1904 = vmatprep.mubr.bf16.mxu0 %v3529_v37  ;;  %1945 = vmatprep.mubr.bf16.mxu1 %v3529_v37  ;;  %v1785_v37 = vld [vmem:[#allocation4 + $0x1c] sm:$0xf] }
 0x80c   :  { %1875 = vmatpush1.bf16.msra.mxu0 %v3291_v9  ;;  %1916 = vmatpush1.bf16.msra.mxu1 %v3294_v10  ;;  %v2341_v9 = vld [vmem:[#allocation10 + $0x18] sm:$0xff]   ;;  %v2342_v10 = vld [vmem:[#allocation10 + $0x20] sm:$0xff]  }
 0x80d   :  { %1876 = vmatprep.subr.bf16.mxu0 %v3297_v11  ;;  %1917 = vmatprep.subr.bf16.mxu1 %v3300_v32  ;;  %v2343_v11 = vld [vmem:[#allocation10 + $0x28] sm:$0xff]   ;;  %v2344_v32 = vld [vmem:[#allocation10 + $0x30] sm:$0xff]  }
 0x810   :  { %1877 = vmatpush1.bf16.msra.mxu0 %v3303_v43  ;;  %1918 = vmatpush1.bf16.msra.mxu1 %v3306_v59  ;;  %v2345_v43 = vld [vmem:[#allocation10 + $0x38] sm:$0xff]  }
 0x811   :  { %1878 = vmatprep.subr.bf16.mxu0 %v3309_v31  ;;  %1919 = vmatprep.subr.bf16.mxu1 %v3312_v60 }
 0x814   :  { %1879 = vmatpush1.bf16.msra.mxu0 %v3315_v58  ;;  %1920 = vmatpush1.bf16.msra.mxu1 %v3318_v53 }
 0x815   :  { %2233 = vmatprep.subr.bf16.mxu0 %v2654_v6 }
 0x817   :  { %2210 = vmatmul.mubr.msk.bf16.vlgmr.msra.gmra.mrb[56].mxu0 %vm482_vm0, %v1785_v37  ;;  %2211 = vmatmul.mubr.msk.bf16.vlgmr.msra.gmra.mrb[64].mxu1 %vm482_vm0, %v1785_v37 }
 0x818   :  { %2234 = vmatpush3.bf16.msra.mxu0 %v2338_v12  ;;  %2249 = vmatprep.mubr.msk.bf16.mxu0 %vm2655_vm1, %v2654_v6 }
 0x819   :  { %2235 = vmatprep.subr.bf16.mxu0 %v2654_v6 }
 0x81c   :  { %2236 = vmatpush3.bf16.msra.mxu0 %v2339_v7 }
 0x81d   :  { %2237 = vmatprep.subr.bf16.mxu0 %v2654_v6 }
 0x820   :  { %2238 = vmatpush3.bf16.msra.mxu0 %v2340_v8 }
 0x821   :  { %2239 = vmatprep.subr.bf16.mxu0 %v2654_v6 }
 0x824   :  { %2240 = vmatpush3.bf16.msra.mxu0 %v2341_v9 }
 0x825   :  { %2241 = vmatprep.subr.bf16.mxu0 %v2654_v6 }
 0x828   :  { %2242 = vmatpush3.bf16.msra.mxu0 %v2342_v10 }
 0x829   :  { %2243 = vmatprep.subr.bf16.mxu0 %v2654_v6 }
 0x82c   :  { %2244 = vmatpush3.bf16.msra.mxu0 %v2343_v11 }
 0x82d   :  { %2245 = vmatprep.subr.bf16.mxu0 %v2654_v6 }
 0x830   :  { %2246 = vmatpush3.bf16.msra.mxu0 %v2344_v32 }
 0x831   :  { %2247 = vmatprep.subr.bf16.mxu0 %v2654_v6 }
 0x834   :  { %2248 = vmatpush3.bf16.msra.mxu0 %v2345_v43 }
 0x8da   :  { %v1821_v59 = vpop.f32.mrb[52].mxu0  ;;  %v1862_v31 = vpop.f32.mrb[60].mxu1 }
 0x8db   :  { %v1823_v60 = vpop.f32.mrb[53].mxu0  ;;  %v1864_v58 = vpop.f32.mrb[61].mxu1 }
 0x8dc   :  { %v1825_v53 = vpop.f32.mrb[54].mxu0  ;;  %v1866_v57 = vpop.f32.mrb[62].mxu1 }
 0x8dd   :  { %v1826_v49 = vpop.f32.mrb[55].mxu0  ;;  %v1867_v50 = vpop.f32.mrb[63].mxu1 }
 0x8ea   :  { %v1906_v55 = vpop.f32.mrb[56].mxu0  ;;  %v1947_v13 = vpop.f32.mrb[64].mxu1 }
 0x8eb   :  { %v1907_v14 = vadd.f32 %v1906_v55, %v1821_v59  ;;  %v1948_v15 = vadd.f32 %v1947_v13, %v1862_v31  ;;  %v1908_v16 = vpop.f32.mrb[57].mxu0  ;;  %v1949_v17 = vpop.f32.mrb[65].mxu1 }
 0x8ec   :  { %v1909_v18 = vadd.f32 %v1908_v16, %v1823_v60  ;;  %v1950_v19 = vadd.f32 %v1949_v17, %v1864_v58  ;;  %v1910_v20 = vpop.f32.mrb[58].mxu0  ;;  %v1951_v21 = vpop.f32.mrb[66].mxu1 }
 0x8ed   :  { %v1954_v1 = vadd.f32 %v1907_v14, %v3537_v22  ;;  %v1911_v2 = vpop.f32.mrb[59].mxu0  ;;  %v1952_v3 = vpop.f32.mrb[67].mxu1  ;;  %v1956_v42 = vadd.f32 %v1948_v15, %v2954_v61 }
 0x8ee   :  { %v1955_v54 = vadd.f32 %v1909_v18, %v2950_v0  ;;  %v1957_v35 = vadd.f32 %v1950_v19, %v2956_v63 }
 0x8ef   :  { %v2212_v27 = vmul.f32 -1.442695, %v1954_v1  ;;  %v2214_v25 = vmul.f32 -1.442695, %v1956_v42 }
 0x8f0   :  { %v2213_v4 = vmul.f32 -1.442695, %v1955_v54 }
 0x8f1   :  { %2458 = vpow2.f32 %v2212_v27 }
 0x8f2   :  { %2460 = vpow2.f32 %v2213_v4 }
 0x8f3   :  { %2462 = vtanh.f32 %v1957_v35 }
 0x8f4   :  { %2464 = vpow2.f32 %v2214_v25 }
 0x8fb   :  { %v2459_v24 = vpop.eup %2458 }
 0x8fc   :  { %v1967_v52 = vadd.f32 1.0, %v2459_v24  ;;  %v2461_v51 = vpop.eup %2460 }
 0x8fd   :  { %v1968_v22 = vadd.f32 1.0, %v2461_v51  ;;  %v2463_v26 = vpop.eup %2462 }
 0x8fe   :  { %2466 = vrcp.f32 %v1967_v52  ;;  %v2465_v23 = vpop.eup %2464 }
 0x8ff   :  { %2468 = vrcp.f32 %v1968_v22  ;;  %v1969_v56 = vadd.f32 1.0, %v2465_v23 }
 0x901   :  { %2470 = vrcp.f32 %v1969_v56 }
 0x908   :  { %v2467_v0 = vpop.eup %2466 }
 0x909   :  { %v1978_v62 = vmul.f32 %v2467_v0, %v2463_v26  ;;  %v2469_v28 = vpop.eup %2468 }
 0x90a   :  { %v1977_v33 = vmul.f32 %v2469_v28, %v3428_v44 }
 0x90b   :  { %v2471_v63 = vpop.eup %2470 }
 0x90c   :  { %v1979_v61 = vadd.f32 %v1978_v62, %v1977_v33 }
 0x90e   :  { %2472 = vtanh.f32 %v1979_v61 }
 0x918   :  { %v2473_v29 = vpop.eup %2472 }
 0x919   :  { %v1981_v5 = vmul.f32 %v2473_v29, %v2471_v63 }
 0x91b   :  { %v1987_v30 = vpack.c.bf16 %v1981_v5, %v1981_v5 }
 0x91d   :  { %2250 = vmatmul.mubr.bf16.vlgmr.msra.gmra.mrb[60].mxu0 %v1987_v30 }
 0x9f0   :  { %v2093_v36 = vpop.f32.mrb[60].mxu0 }
 0x9f1   :  { %v2094_v38 = vadd.f32 %v2215_v34, %v2093_v36  ;;  %v2251_v39 = vpop.f32.mrb[61].mxu0 }
 0x9f2   :  { %v2096_v40 = vpop.f32.mrb[62].mxu0 }
 0x9f3   :  { %2099 = vmax.xlane.f32.xlu0 %v2094_v38  ;;  %v2252_v41 = vpop.f32.mrb[63].mxu0 }
 0xa80   :  { %v2100_v45 = vpop.xlane.xlu0 %2099 }
 0xa81   :  { %v2101_v44 = vsub.f32 %v2094_v38, %v2100_v45 }
 0xa83   :  { %v2102_v46 = vmul.f32 1.442695, %v2101_v44 }
 0xa85   :  { %2474 = vpow2.f32 %v2102_v46 }
 0xa8f   :  { %v2475_v47 = vpop.eup %2474 }
 0xa90   :  { %2104 = vadd.xlane.f32.xlu0 %v2475_v47 }
 0xb1d   :  { %v2105_v48 = vpop.xlane.xlu0 %2104 }
 0xb1e   :  { %2476 = vlog2.f32 %v2105_v48 }
 0xb28   :  { %v2477_v37 = vpop.eup %2476 }
 0xb29   :  { %v2107_v12 = vmul.f32 0.6931472, %v2477_v37 }
 0xb2b   :  { %v2108_v6 = vsub.f32 %v2101_v44, %v2107_v12 }
 0xb2d   :  { %2109 = vst [vmem:[#allocation12] sm:$0xff] %v2108_v6 }
 0xb2e   :  { %2625 = shalt.err (!%p2622_p8)
}
 0xb2f   :  { %s2626_s27 = scalar_lea.hbm %s3475_s6, 128 }
 0xb30   :  { %p2627_p9 = scmp.ne.s32.totalorder %s3475_s6, %s2626_s27  ;;  %p2630_p10 = scmp.lt.u32.totalorder %s2626_s27, %s3475_s6 }
 0xb32   :  { %p2632_p11 = pnand %p2630_p10, %p2627_p9 }
 0xb34   :  { %2635 = shalt.err (!%p2632_p11)
}
 0xb35   :  { %2119 = dma.vmem_to_hbm [thread:$0]  %s2117_s24, 128, %s3475_s6, [#allocation6]  }
 0xb36   :  { %2642 = dma.done.wait [#allocation6], 128  }
 0xb37   :  { %2643 = vsyncadd [#allocation6], 4294967168 }
 0xb38   :  { %2123 = vsyncpa [#allocation5], 1 }
 0xb39   :  { %2124 = vsyncpa [#allocation8], 1 }
 0xb3a   :  { %2125 = vsyncpa [#allocation11], 1 }
 0xb3b   :  { %2126 = vsyncpa [#allocation6], 1 }

</bundles_post_ra>
